<compile_context>
chip_gen: v7x
topology: tpu7x:2x2x1
jax: 0.10.0
libtpu: 0.0.40
codegen_flags: <defaults>
</compile_context>

<pallas_src>
import functools
import math

import jax
import jax.numpy as jnp
from jax.experimental import pallas as pl
from jax.experimental.pallas import tpu as pltpu

_VMEM_LIMIT = 48 * 1024 * 1024    # scoped VMEM limit (< v7x 64 MiB physical)
_TILE_BUDGET = 36 * 1024 * 1024   # target footprint used when sizing tiles


def _cparams(*semantics):
    return pltpu.CompilerParams(dimension_semantics=semantics,
                                vmem_limit_bytes=_VMEM_LIMIT)


def _pick_row_tile(m, preferred=2048):
    """Largest multiple of 8 <= preferred that divides m (fallback: m)."""
    t = min(preferred, m)
    t -= t % 8
    while t >= 8:
        if m % t == 0:
            return t
        t -= 8
    return m


def _row_tile(m, per_row_bytes, resident_bytes, preferred=2048):
    """VMEM-budgeted row tile (double-buffered tiles kept under budget)."""
    avail = max(_TILE_BUDGET - resident_bytes, 8 * per_row_bytes)
    pref = min(preferred, max(8, avail // max(per_row_bytes, 1)))
    return _pick_row_tile(m, pref)


def _pick_col_tile(n, preferred=512):
    """N tile: prefer multiples of 256, then 128; else the full dim."""
    if n <= preferred:
        return n
    for g in (256, 128):
        t = (preferred // g) * g
        while t >= g:
            if n % t == 0:
                return t
            t -= g
    # TODO(synk): pad awkward widths (e.g. so400m intermediate_size=4304) to a
    # multiple of 256 at init instead of falling back to one full-width block.
    return n


_GELU_C = math.sqrt(2.0 / math.pi)


def _gelu_tanh(y):
    return 0.5 * y * (1.0 + jnp.tanh(_GELU_C * (y + 0.044715 * (y * y * y))))


# ----------------------------- Pallas kernels ------------------------------

def _patch_embed_kernel(x_ref, w_ref, b_ref, pos_ref, o_ref):
    # x: (tm, C*P*P) bf16 ; w: (C*P*P, D) bf16 ; b: (1, D) f32 ; pos: (tm, D) f32
    y = jnp.dot(x_ref[...], w_ref[...], preferred_element_type=jnp.float32)
    o_ref[...] = (y + b_ref[...] + pos_ref[...]).astype(o_ref.dtype)


def _ln_to_scratch(x_ref, g_ref, b_ref, xn_ref, eps):
    # Exact full-K LayerNorm in f32, cached as bf16 in VMEM scratch.
    x = x_ref[...].astype(jnp.float32)
    mu = jnp.mean(x, axis=-1, keepdims=True)
    var = jnp.mean(jnp.square(x - mu), axis=-1, keepdims=True)
    xn = (x - mu) * jax.lax.rsqrt(var + eps)
    xn_ref[...] = (xn * g_ref[...] + b_ref[...]).astype(xn_ref.dtype)


def _ln_qkv_kernel(x_ref, g_ref, b_ref, w_ref, bias_ref, o_ref, xn_ref, *, eps):
    # grid = (M//tm, 3*nH); i outer ("parallel"), j inner ("arbitrary").
    # LayerNorm is computed once per row tile and reused for all head columns.
    @pl.when(pl.program_id(1) == 0)
    def _():
        _ln_to_scratch(x_ref, g_ref, b_ref, xn_ref, eps)

    y = jnp.dot(xn_ref[...], w_ref[0], preferred_element_type=jnp.float32)
    o_ref[0] = (y + bias_ref[0]).astype(o_ref.dtype)


def _ln_mlp_kernel(x_ref, g_ref, b_ref, w_ref, bias_ref, o_ref, xn_ref, *, eps):
    # Fused LN2 + fc1 + gelu_tanh; same normalized-x caching as _ln_qkv_kernel.
    @pl.when(pl.program_id(1) == 0)
    def _():
        _ln_to_scratch(x_ref, g_ref, b_ref, xn_ref, eps)

    y = jnp.dot(xn_ref[...], w_ref[...], preferred_element_type=jnp.float32)
    o_ref[...] = _gelu_tanh(y + bias_ref[...]).astype(o_ref.dtype)


def _matmul_res_kernel(x_ref, w_ref, b_ref, r_ref, o_ref):
    # Full weight resident in VMEM (constant block index); bias+residual fused.
    y = jnp.dot(x_ref[...], w_ref[...], preferred_element_type=jnp.float32)
    o_ref[...] = (y + b_ref[...] + r_ref[...].astype(jnp.float32)).astype(o_ref.dtype)


def _attn_oproj_kernel(q_ref, k_ref, v_ref, ow_ref, ob_ref, r_ref, o_ref,
                       acc_ref, *, scale):
    # grid = (B, nH): batch "parallel", head "arbitrary" (reduction into the
    # fused o-projection f32 accumulator). Per-head blocks are lane-dense.
    h = pl.program_id(1)

    @pl.when(h == 0)
    def _():
        acc_ref[...] = jnp.zeros_like(acc_ref)

    # Fold the softmax scale into q (S*Dh muls instead of S*S).
    q = (q_ref[0].astype(jnp.float32) * scale).astype(jnp.bfloat16)
    s = jax.lax.dot_general(q, k_ref[0], (((1,), (1,)), ((), ())),
                            preferred_element_type=jnp.float32)         # (S, S)
    m = jnp.max(s, axis=-1, keepdims=True)
    p = jnp.exp(s - m)
    p = p / jnp.sum(p, axis=-1, keepdims=True)                          # exact
    ctx = jnp.dot(p.astype(jnp.bfloat16), v_ref[0],
                  preferred_element_type=jnp.float32)                   # (S, Dh)
    # Fused o-projection: accumulate ctx @ o_w[h] into the (S, D) accumulator.
    acc_ref[...] += jnp.dot(ctx.astype(jnp.bfloat16), ow_ref[0],
                            preferred_element_type=jnp.float32)

    @pl.when(h == pl.num_programs(1) - 1)
    def _():
        o_ref[...] = (acc_ref[...] + ob_ref[...]
                      + r_ref[...].astype(jnp.float32)).astype(o_ref.dtype)


def _layernorm_kernel(x_ref, g_ref, b_ref, o_ref, *, eps):
    x = x_ref[...].astype(jnp.float32)
    mu = jnp.mean(x, axis=-1, keepdims=True)
    var = jnp.mean(jnp.square(x - mu), axis=-1, keepdims=True)
    o_ref[...] = ((x - mu) * jax.lax.rsqrt(var + eps) * g_ref[...]
                  + b_ref[...]).astype(o_ref.dtype)


# ------------------------------ thin wrappers -------------------------------

def patch_embed(patches, w, b, pos):
    """patches: (M=B*S, C*P*P) bf16; returns (M, D) bf16 with pos-emb added."""
    M, Kp = patches.shape
    S, D = pos.shape
    tm = _row_tile(S, per_row_bytes=4 * Kp + 8 * D + 4 * D,
                   resident_bytes=4 * Kp * D, preferred=1024)   # tm divides S
    n_pos = S // tm
    return pl.pallas_call(
        _patch_embed_kernel,
        out_shape=jax.ShapeDtypeStruct((M, D), jnp.bfloat16),
        grid=(M // tm,),
        in_specs=[
            pl.BlockSpec((tm, Kp), lambda i: (i, 0)),
            pl.BlockSpec((Kp, D), lambda i: (0, 0)),
            pl.BlockSpec((1, D), lambda i: (0, 0)),
            pl.BlockSpec((tm, D), lambda i: (i % n_pos, 0)),
        ],
        out_specs=pl.BlockSpec((tm, D), lambda i: (i, 0)),
        compiler_params=_cparams("parallel"),
        cost_estimate=pl.CostEstimate(
            flops=2 * M * Kp * D, transcendentals=0,
            bytes_accessed=2 * (M * Kp + Kp * D + M * D)),
    )(patches, w, b.reshape(1, D), pos)


def ln_qkv_proj(x, g, b, w, bias, eps):
    """head-major QKV = LayerNorm(x) @ w + bias.

    x: (M, D) bf16 ; w: (3*nH, D, Dh) bf16 ; bias: (3*nH, 1, Dh) f32
    returns (3*nH, M, Dh) bf16 (each per-head block lane-dense in its last dim).
    """
    M, K = x.shape
    nJ, _, Dh = w.shape
    tm = _row_tile(M, per_row_bytes=4 * K + 2 * K + 4 * Dh,
                   resident_bytes=4 * K * Dh)
    return pl.pallas_call(
        functools.partial(_ln_qkv_kernel, eps=eps),
        out_shape=jax.ShapeDtypeStruct((nJ, M, Dh), jnp.bfloat16),
        grid=(M // tm, nJ),
        in_specs=[
            pl.BlockSpec((tm, K), lambda i, j: (i, 0)),
            pl.BlockSpec((1, K), lambda i, j: (0, 0)),
            pl.BlockSpec((1, K), lambda i, j: (0, 0)),
            pl.BlockSpec((1, K, Dh), lambda i, j: (j, 0, 0)),
            pl.BlockSpec((1, 1, Dh), lambda i, j: (j, 0, 0)),
        ],
        out_specs=pl.BlockSpec((1, tm, Dh), lambda i, j: (j, i, 0)),
        scratch_shapes=[pltpu.VMEM((tm, K), jnp.bfloat16)],
        compiler_params=_cparams("parallel", "arbitrary"),
        cost_estimate=pl.CostEstimate(
            flops=2 * M * K * nJ * Dh, transcendentals=M,
            bytes_accessed=2 * (M * K + K * nJ * Dh + M * nJ * Dh)),
    )(x, g.reshape(1, K), b.reshape(1, K), w, bias)


def attention_oproj(qkv_hm, o_w, o_b, residual, *, batch, seq, num_heads,
                    head_dim):
    """Multi-head attention with o-projection + bias + residual fused.

    qkv_hm: (3*nH, B*S, Dh) bf16 head-major [q heads | k heads | v heads]
    o_w: (nH, Dh, D) bf16 ; residual: (B*S, D) bf16 ; returns (B*S, D) bf16.
    """
    D = num_heads * head_dim
    M = batch * seq
    scale = head_dim ** -0.5
    return pl.pallas_call(
        functools.partial(_attn_oproj_kernel, scale=scale),
        out_shape=jax.ShapeDtypeStruct((M, D), jnp.bfloat16),
        grid=(batch, num_heads),
        in_specs=[
            pl.BlockSpec((1, seq, head_dim), lambda bi, h: (h, bi, 0)),
            pl.BlockSpec((1, seq, head_dim),
                         lambda bi, h: (num_heads + h, bi, 0)),
            pl.BlockSpec((1, seq, head_dim),
                         lambda bi, h: (2 * num_heads + h, bi, 0)),
            pl.BlockSpec((1, head_dim, D), lambda bi, h: (h, 0, 0)),
            pl.BlockSpec((1, D), lambda bi, h: (0, 0)),
            pl.BlockSpec((seq, D), lambda bi, h: (bi, 0)),
        ],
        out_specs=pl.BlockSpec((seq, D), lambda bi, h: (bi, 0)),
        scratch_shapes=[pltpu.VMEM((seq, D), jnp.float32)],
        compiler_params=_cparams("parallel", "arbitrary"),
        cost_estimate=pl.CostEstimate(
            flops=4 * batch * num_heads * seq * seq * head_dim + 2 * M * D * D,
            transcendentals=batch * num_heads * seq * seq,
            bytes_accessed=2 * (3 * M * D + D * D + 2 * M * D)),
    )(qkv_hm, qkv_hm, qkv_hm, o_w, o_b.reshape(1, D), residual)


def ln_mlp_fc1(x, g, b, w, bias, eps):
    """gelu_tanh(LayerNorm(x) @ w + bias); x:(M,D) bf16, w:(D,I) bf16 -> bf16."""
    M, K = x.shape
    N = w.shape[1]
    tn = _pick_col_tile(N)
    tm = _row_tile(M, per_row_bytes=4 * K + 2 * K + 4 * tn,
                   resident_bytes=4 * K * tn)
    return pl.pallas_call(
        functools.partial(_ln_mlp_kernel, eps=eps),
        out_shape=jax.ShapeDtypeStruct((M, N), jnp.bfloat16),
        grid=(M // tm, N // tn),
        in_specs=[
            pl.BlockSpec((tm, K), lambda i, j: (i, 0)),
            pl.BlockSpec((1, K), lambda i, j: (0, 0)),
            pl.BlockSpec((1, K), lambda i, j: (0, 0)),
            pl.BlockSpec((K, tn), lambda i, j: (0, j)),
            pl.BlockSpec((1, tn), lambda i, j: (0, j)),
        ],
        out_specs=pl.BlockSpec((tm, tn), lambda i, j: (i, j)),
        scratch_shapes=[pltpu.VMEM((tm, K), jnp.bfloat16)],
        compiler_params=_cparams("parallel", "arbitrary"),
        cost_estimate=pl.CostEstimate(
            flops=2 * M * K * N, transcendentals=M * N,
            bytes_accessed=2 * (M * K + K * N + M * N)),
    )(x, g.reshape(1, K), b.reshape(1, K), w, bias.reshape(1, N))


def matmul_residual(x, w, bias, residual):
    """x @ w + bias + residual with the full weight resident in VMEM."""
    M, K = x.shape
    N = w.shape[1]
    tm = _row_tile(M, per_row_bytes=4 * K + 8 * N, resident_bytes=4 * K * N)
    return pl.pallas_call(
        _matmul_res_kernel,
        out_shape=jax.ShapeDtypeStruct((M, N), jnp.bfloat16),
        grid=(M // tm,),
        in_specs=[
            pl.BlockSpec((tm, K), lambda i: (i, 0)),
            pl.BlockSpec((K, N), lambda i: (0, 0)),   # constant index: one DMA
            pl.BlockSpec((1, N), lambda i: (0, 0)),
            pl.BlockSpec((tm, N), lambda i: (i, 0)),
        ],
        out_specs=pl.BlockSpec((tm, N), lambda i: (i, 0)),
        compiler_params=_cparams("parallel"),
        cost_estimate=pl.CostEstimate(
            flops=2 * M * K * N, transcendentals=0,
            bytes_accessed=2 * (M * K + K * N + 2 * M * N)),
    )(x, w, bias.reshape(1, N), residual)


def layernorm(x, g, b, eps, out_dtype=jnp.float32):
    M, D = x.shape
    tm = _pick_row_tile(M, 2048)
    return pl.pallas_call(
        functools.partial(_layernorm_kernel, eps=eps),
        out_shape=jax.ShapeDtypeStruct((M, D), out_dtype),
        grid=(M // tm,),
        in_specs=[
            pl.BlockSpec((tm, D), lambda i: (i, 0)),
            pl.BlockSpec((1, D), lambda i: (0, 0)),
            pl.BlockSpec((1, D), lambda i: (0, 0)),
        ],
        out_specs=pl.BlockSpec((tm, D), lambda i: (i, 0)),
        compiler_params=_cparams("parallel"),
    )(x, g.reshape(1, D), b.reshape(1, D))


# ------------------------------ full model ----------------------------------

def siglip_vision_model(pixel_values, params, config):
    B, C, H, W = pixel_values.shape
    P = config["patch_size"]
    D = config["hidden_size"]
    nH = config["num_attention_heads"]
    Dh = D // nH
    Hp, Wp = H // P, W // P
    S = Hp * Wp
    M = B * S
    eps = config["layer_norm_eps"]

    # SiglipVisionEmbeddings: valid conv(stride=P) == matmul over flattened
    # (C, P, P) patches. PyTorch conv weight (D,C,P,P) maps to
    # patch_w = weight.reshape(D, C*P*P).T (layout must match this flatten).
    x = pixel_values.reshape(B, C, Hp, P, Wp, P)
    x = x.transpose(0, 2, 4, 1, 3, 5).reshape(M, C * P * P)
    h = patch_embed(x.astype(jnp.bfloat16), params["patch_w"],
                    params["patch_b"], params["pos_emb"])          # (M, D) bf16

    # Encoder: L x [LN1+QKV -> attn(+o-proj,+res) ; LN2+fc1(gelu) -> fc2(+res)]
    # TODO(synk): residual stream kept in bf16 (reference is fp32); fine for
    # inference but small drift accumulates over many layers.
    for layer in params["layers"]:
        qkv = ln_qkv_proj(h, layer["ln1_g"], layer["ln1_b"],
                          layer["qkv_w"], layer["qkv_b"], eps)     # (3nH, M, Dh)
        h = attention_oproj(qkv, layer["o_w"], layer["o_b"], h,
                            batch=B, seq=S, num_heads=nH, head_dim=Dh)
        ff = ln_mlp_fc1(h, layer["ln2_g"], layer["ln2_b"],
                        layer["fc1_w"], layer["fc1_b"], eps)       # (M, I)
        h = matmul_residual(ff, layer["fc2_w"], layer["fc2_b"], h)  # (M, D)

    out = layernorm(h, params["post_ln_g"], params["post_ln_b"], eps)
    return out.reshape(B, S, D)


# ----------------------------- param init -----------------------------------

def init_params(key, config):
    D = config["hidden_size"]
    I = config["intermediate_size"]
    C = config["num_channels"]
    P = config["patch_size"]
    S = (config["image_size"] // P) ** 2
    L = config["num_hidden_layers"]
    nH = config["num_attention_heads"]
    Dh = D // nH

    def dense(k, shape, scale=0.02):
        return (scale * jax.random.normal(k, shape)).astype(jnp.bfloat16)

    keys = jax.random.split(key, 2 + L)
    params = {
        "patch_w": dense(keys[0], (C * P * P, D)),
        "patch_b": jnp.zeros((D,), jnp.float32),
        "pos_emb": (0.02 * jax.random.normal(keys[1], (S, D))).astype(jnp.float32),
        "post_ln_g": jnp.ones((D,), jnp.float32),
        "post_ln_b": jnp.zeros((D,), jnp.float32),
        "layers": [],
    }
    for l in range(L):
        lk = jax.random.split(keys[2 + l], 4)
        params["layers"].append({
            "ln1_g": jnp.ones((D,), jnp.float32),
            "ln1_b": jnp.zeros((D,), jnp.float32),
            # Head-major fused QKV weight (3*nH, D, Dh).  From PyTorch:
            #   stack over [q,k,v] of proj.weight.T.reshape(D, nH, Dh)
            #   .transpose(1, 0, 2)  ->  (3*nH, D, Dh).
            "qkv_w": dense(lk[0], (3 * nH, D, Dh)),
            "qkv_b": jnp.zeros((3 * nH, 1, Dh), jnp.float32),
            # o_w[h] = out_proj.weight.T[h*Dh:(h+1)*Dh, :]  ->  (nH, Dh, D).
            "o_w": dense(lk[1], (nH, Dh, D)),
            "o_b": jnp.zeros((D,), jnp.float32),
            "ln2_g": jnp.ones((D,), jnp.float32),
            "ln2_b": jnp.zeros((D,), jnp.float32),
            "fc1_w": dense(lk[2], (D, I)),
            "fc1_b": jnp.zeros((I,), jnp.float32),
            "fc2_w": dense(lk[3], (I, D)),
            "fc2_b": jnp.zeros((D,), jnp.float32),
        })
    return params


if __name__ == "__main__":
    config = dict(
        hidden_size=32,
        intermediate_size=64,
        num_hidden_layers=2,
        num_attention_heads=4,
        num_channels=3,
        image_size=32,
        patch_size=8,
        layer_norm_eps=1e-6,
    )
    key = jax.random.PRNGKey(0)
    pkey, ikey = jax.random.split(key)
    params = init_params(pkey, config)
    pixel_values = jax.random.normal(ikey, (2, 3, 32, 32), dtype=jnp.float32)

    fwd = jax.jit(functools.partial(siglip_vision_model, config=config))
    out = fwd(pixel_values, params)
    out = jax.block_until_ready(out)
    assert out.shape == (2, 16, 32), out.shape
    assert bool(jnp.all(jnp.isfinite(out)))
    print("KERNEL_OK")
</pallas_src>

<mosaic_0001>
module attributes {stable_mosaic.version = 11 : i64} {
  func.func @_patch_embed_kernel(%arg0: i32, %arg1: memref<16x192xbf16, #tpu.memory_space<vmem>>, %arg2: memref<192x32xbf16, #tpu.memory_space<vmem>>, %arg3: memref<1x32xf32, #tpu.memory_space<vmem>>, %arg4: memref<16x32xf32, #tpu.memory_space<vmem>>, %arg5: memref<16x32xbf16, #tpu.memory_space<vmem>>) attributes {dimension_semantics = [#tpu.dimension_semantics<parallel>], iteration_bounds = array<i64: 2>, scalar_prefetch = 0 : i64, scratch_operands = 0 : i64, tpu.core_type = #tpu.core_type<tc>, window_params = [{transform_indices = @transform_0, window_bounds = array<i64: 16, 192>}, {pipeline_mode = #tpu.pipeline_mode<synchronous>, transform_indices = @transform_1, window_bounds = array<i64: 192, 32>}, {pipeline_mode = #tpu.pipeline_mode<synchronous>, transform_indices = @transform_2, window_bounds = array<i64: 1, 32>}, {transform_indices = @transform_3, window_bounds = array<i64: 16, 32>}, {transform_indices = @transform_4, window_bounds = array<i64: 16, 32>}]} {
    %c0 = arith.constant 0 : index
    %c0_0 = arith.constant 0 : index
    %0 = vector.load %arg1[%c0, %c0_0] : memref<16x192xbf16, #tpu.memory_space<vmem>>, vector<16x192xbf16>
    %c0_1 = arith.constant 0 : index
    %c0_2 = arith.constant 0 : index
    %1 = vector.load %arg2[%c0_1, %c0_2] : memref<192x32xbf16, #tpu.memory_space<vmem>>, vector<192x32xbf16>
    %cst = arith.constant dense<0.000000e+00> : vector<16x32xf32>
    %2 = tpu.matmul %0, %1, %cst {dimension_numbers = #tpu.dot_dimension_numbers<[1], [0], [0], [1], [0, 0, 1, 1], [], []>} : vector<16x192xbf16>, vector<192x32xbf16>, vector<16x32xf32> -> vector<16x32xf32>
    %c0_3 = arith.constant 0 : index
    %c0_4 = arith.constant 0 : index
    %3 = vector.load %arg3[%c0_3, %c0_4] : memref<1x32xf32, #tpu.memory_space<vmem>>, vector<1x32xf32>
    %4 = vector.broadcast %3 : vector<1x32xf32> to vector<16x32xf32>
    %5 = arith.addf %2, %4 : vector<16x32xf32>
    %c0_5 = arith.constant 0 : index
    %c0_6 = arith.constant 0 : index
    %6 = vector.load %arg4[%c0_5, %c0_6] : memref<16x32xf32, #tpu.memory_space<vmem>>, vector<16x32xf32>
    %7 = arith.addf %5, %6 : vector<16x32xf32>
    %8 = arith.truncf %7 : vector<16x32xf32> to vector<16x32xbf16>
    %c0_7 = arith.constant 0 : index
    %c0_8 = arith.constant 0 : index
    %9 = vector.load %arg5[%c0_7, %c0_8] : memref<16x32xbf16, #tpu.memory_space<vmem>>, vector<16x32xbf16>
    tpu.vector_store %arg5[%c0_7, %c0_8], %8 {strides = array<i32>} : memref<16x32xbf16, #tpu.memory_space<vmem>>, vector<16x32xbf16>,
    return
  }
  func.func @transform_0(%arg0: i32) -> (i32, i32) {
    %c0_i32 = arith.constant 0 : i32
    %c0_i32_0 = arith.constant 0 : i32
    return %arg0, %c0_i32 : i32, i32
  }
  func.func @transform_1(%arg0: i32) -> (i32, i32) {
    %c0_i32 = arith.constant 0 : i32
    %c0_i32_0 = arith.constant 0 : i32
    %c0_i32_1 = arith.constant 0 : i32
    return %c0_i32, %c0_i32_0 : i32, i32
  }
  func.func @transform_2(%arg0: i32) -> (i32, i32) {
    %c0_i32 = arith.constant 0 : i32
    %c0_i32_0 = arith.constant 0 : i32
    %c0_i32_1 = arith.constant 0 : i32
    return %c0_i32, %c0_i32_0 : i32, i32
  }
  func.func @transform_3(%arg0: i32) -> (i32, i32) {
    %c1_i32 = arith.constant 1 : i32
    %c0_i32 = arith.constant 0 : i32
    %0 = arith.cmpi eq, %c1_i32, %c0_i32 : i32
    %c1_i32_0 = arith.constant 1 : i32
    %1 = arith.select %0, %c1_i32_0, %c1_i32 : i32
    %2 = arith.remsi %arg0, %1 : i32
    %c0_i32_1 = arith.constant 0 : i32
    %3 = arith.cmpi ne, %2, %c0_i32_1 : i32
    %c0_i32_2 = arith.constant 0 : i32
    %4 = arith.cmpi slt, %2, %c0_i32_2 : i32
    %c0_i32_3 = arith.constant 0 : i32
    %5 = arith.cmpi slt, %1, %c0_i32_3 : i32
    %6 = arith.xori %4, %5 : i1
    %7 = arith.andi %6, %3 : i1
    %8 = arith.addi %2, %1 : i32
    %9 = arith.select %7, %8, %2 : i32
    %c0_i32_4 = arith.constant 0 : i32
    %c0_i32_5 = arith.constant 0 : i32
    return %9, %c0_i32_4 : i32, i32
  }
  func.func @transform_4(%arg0: i32) -> (i32, i32) {
    %c0_i32 = arith.constant 0 : i32
    %c0_i32_0 = arith.constant 0 : i32
    return %arg0, %c0_i32 : i32, i32
  }
}

module attributes {stable_mosaic.version = 11 : i64} {
  func.func @_ln_qkv_kernel(%arg0: i32, %arg1: i32, %arg2: memref<32x32xbf16, #tpu.memory_space<vmem>>, %arg3: memref<1x32xf32, #tpu.memory_space<vmem>>, %arg4: memref<1x32xf32, #tpu.memory_space<vmem>>, %arg5: memref<1x32x8xbf16, #tpu.memory_space<vmem>>, %arg6: memref<1x1x8xf32, #tpu.memory_space<vmem>>, %arg7: memref<1x32x8xbf16, #tpu.memory_space<vmem>>, %arg8: memref<32x32xbf16, #tpu.memory_space<vmem>>) attributes {dimension_semantics = [#tpu.dimension_semantics<parallel>, #tpu.dimension_semantics<arbitrary>], iteration_bounds = array<i64: 1, 12>, scalar_prefetch = 0 : i64, scratch_operands = 1 : i64, tpu.core_type = #tpu.core_type<tc>, window_params = [{transform_indices = @transform_0, window_bounds = array<i64: 32, 32>}, {pipeline_mode = #tpu.pipeline_mode<synchronous>, transform_indices = @transform_1, window_bounds = array<i64: 1, 32>}, {pipeline_mode = #tpu.pipeline_mode<synchronous>, transform_indices = @transform_2, window_bounds = array<i64: 1, 32>}, {transform_indices = @transform_3, window_bounds = array<i64: 1, 32, 8>}, {transform_indices = @transform_4, window_bounds = array<i64: 1, 1, 8>}, {transform_indices = @transform_5, window_bounds = array<i64: 1, 32, 8>}]} {
    %c0_i32 = arith.constant 0 : i32
    %0 = arith.cmpi eq, %arg1, %c0_i32 : i32
    %1 = arith.extui %0 : i1 to i32
    %c0_i32_0 = arith.constant 0 : i32
    %2 = arith.cmpi ne, %1, %c0_i32_0 : i32
    scf.if %2 {
      %c0_11 = arith.constant 0 : index
      %c0_12 = arith.constant 0 : index
      %15 = vector.load %arg2[%c0_11, %c0_12] : memref<32x32xbf16, #tpu.memory_space<vmem>>, vector<32x32xbf16>
      %16 = arith.extf %15 : vector<32x32xbf16> to vector<32x32xf32>
      %cst_13 = arith.constant dense<0.000000e+00> : vector<32xf32>
      %17 = vector.multi_reduction <add>, %16, %cst_13 [1] : vector<32x32xf32> to vector<32xf32>
      %18 = vector.shape_cast %17 : vector<32xf32> to vector<32x1xf32>
      %cst_14 = arith.constant 3.200000e+01 : f32
      %19 = vector.broadcast %cst_14 : f32 to vector<32x1xf32>
      %20 = arith.divf %18, %19 : vector<32x1xf32>
      %21 = vector.broadcast %20 : vector<32x1xf32> to vector<32x32xf32>
      %22 = arith.subf %16, %21 : vector<32x32xf32>
      %23 = arith.mulf %22, %22 : vector<32x32xf32>
      %cst_15 = arith.constant dense<0.000000e+00> : vector<32xf32>
      %24 = vector.multi_reduction <add>, %23, %cst_15 [1] : vector<32x32xf32> to vector<32xf32>
      %25 = vector.shape_cast %24 : vector<32xf32> to vector<32x1xf32>
      %cst_16 = arith.constant 3.200000e+01 : f32
      %26 = vector.broadcast %cst_16 : f32 to vector<32x1xf32>
      %27 = arith.divf %25, %26 : vector<32x1xf32>
      %28 = vector.broadcast %20 : vector<32x1xf32> to vector<32x32xf32>
      %29 = arith.subf %16, %28 : vector<32x32xf32>
      %cst_17 = arith.constant 9.99999997E-7 : f32
      %30 = vector.broadcast %cst_17 : f32 to vector<32x1xf32>
      %31 = arith.addf %27, %30 : vector<32x1xf32>
      %32 = math.rsqrt %31 : vector<32x1xf32>
      %33 = vector.broadcast %32 : vector<32x1xf32> to vector<32x32xf32>
      %34 = arith.mulf %29, %33 : vector<32x32xf32>
      %c0_18 = arith.constant 0 : index
      %c0_19 = arith.constant 0 : index
      %35 = vector.load %arg3[%c0_18, %c0_19] : memref<1x32xf32, #tpu.memory_space<vmem>>, vector<1x32xf32>
      %36 = vector.broadcast %35 : vector<1x32xf32> to vector<32x32xf32>
      %37 = arith.mulf %34, %36 : vector<32x32xf32>
      %c0_20 = arith.constant 0 : index
      %c0_21 = arith.constant 0 : index
      %38 = vector.load %arg4[%c0_20, %c0_21] : memref<1x32xf32, #tpu.memory_space<vmem>>, vector<1x32xf32>
      %39 = vector.broadcast %38 : vector<1x32xf32> to vector<32x32xf32>
      %40 = arith.addf %37, %39 : vector<32x32xf32>
      %41 = arith.truncf %40 : vector<32x32xf32> to vector<32x32xbf16>
      %c0_22 = arith.constant 0 : index
      %c0_23 = arith.constant 0 : index
      %42 = vector.load %arg8[%c0_22, %c0_23] : memref<32x32xbf16, #tpu.memory_space<vmem>>, vector<32x32xbf16>
      tpu.vector_store %arg8[%c0_22, %c0_23], %41 {strides = array<i32>} : memref<32x32xbf16, #tpu.memory_space<vmem>>, vector<32x32xbf16>,
    } else {
    }
    %c0 = arith.constant 0 : index
    %c0_1 = arith.constant 0 : index
    %3 = vector.load %arg8[%c0, %c0_1] : memref<32x32xbf16, #tpu.memory_space<vmem>>, vector<32x32xbf16>
    %c0_2 = arith.constant 0 : index
    %c0_3 = arith.constant 0 : index
    %c0_4 = arith.constant 0 : index
    %4 = vector.load %arg5[%c0_2, %c0_3, %c0_4] : memref<1x32x8xbf16, #tpu.memory_space<vmem>>, vector<1x32x8xbf16>
    %5 = vector.shape_cast %4 : vector<1x32x8xbf16> to vector<32x8xbf16>
    %cst = arith.constant dense<0.000000e+00> : vector<32x8xf32>
    %6 = tpu.matmul %3, %5, %cst {dimension_numbers = #tpu.dot_dimension_numbers<[1], [0], [0], [1], [0, 0, 1, 1], [], []>} : vector<32x32xbf16>, vector<32x8xbf16>, vector<32x8xf32> -> vector<32x8xf32>
    %c0_5 = arith.constant 0 : index
    %c0_6 = arith.constant 0 : index
    %c0_7 = arith.constant 0 : index
    %7 = vector.load %arg6[%c0_5, %c0_6, %c0_7] : memref<1x1x8xf32, #tpu.memory_space<vmem>>, vector<1x1x8xf32>
    %8 = vector.shape_cast %7 : vector<1x1x8xf32> to vector<1x8xf32>
    %9 = vector.broadcast %8 : vector<1x8xf32> to vector<32x8xf32>
    %10 = arith.addf %6, %9 : vector<32x8xf32>
    %11 = arith.truncf %10 : vector<32x8xf32> to vector<32x8xbf16>
    %c0_8 = arith.constant 0 : index
    %c0_9 = arith.constant 0 : index
    %c0_10 = arith.constant 0 : index
    %12 = vector.load %arg7[%c0_8, %c0_9, %c0_10] : memref<1x32x8xbf16, #tpu.memory_space<vmem>>, vector<1x32x8xbf16>
    %13 = vector.shape_cast %12 : vector<1x32x8xbf16> to vector<32x8xbf16>
    %14 = vector.shape_cast %11 : vector<32x8xbf16> to vector<1x32x8xbf16>
    tpu.vector_store %arg7[%c0_8, %c0_9, %c0_10], %14 {strides = array<i32>} : memref<1x32x8xbf16, #tpu.memory_space<vmem>>, vector<1x32x8xbf16>,
    return
  }
  func.func @transform_0(%arg0: i32, %arg1: i32) -> (i32, i32) {
    %c0_i32 = arith.constant 0 : i32
    %c0_i32_0 = arith.constant 0 : i32
    return %arg0, %c0_i32 : i32, i32
  }
  func.func @transform_1(%arg0: i32, %arg1: i32) -> (i32, i32) {
    %c0_i32 = arith.constant 0 : i32
    %c0_i32_0 = arith.constant 0 : i32
    %c0_i32_1 = arith.constant 0 : i32
    return %c0_i32, %c0_i32_0 : i32, i32
  }
  func.func @transform_2(%arg0: i32, %arg1: i32) -> (i32, i32) {
    %c0_i32 = arith.constant 0 : i32
    %c0_i32_0 = arith.constant 0 : i32
    %c0_i32_1 = arith.constant 0 : i32
    return %c0_i32, %c0_i32_0 : i32, i32
  }
  func.func @transform_3(%arg0: i32, %arg1: i32) -> (i32, i32, i32) {
    %c0_i32 = arith.constant 0 : i32
    %c0_i32_0 = arith.constant 0 : i32
    %c0_i32_1 = arith.constant 0 : i32
    return %arg1, %c0_i32, %c0_i32_0 : i32, i32, i32
  }
  func.func @transform_4(%arg0: i32, %arg1: i32) -> (i32, i32, i32) {
    %c0_i32 = arith.constant 0 : i32
    %c0_i32_0 = arith.constant 0 : i32
    %c0_i32_1 = arith.constant 0 : i32
    return %arg1, %c0_i32, %c0_i32_0 : i32, i32, i32
  }
  func.func @transform_5(%arg0: i32, %arg1: i32) -> (i32, i32, i32) {
    %c0_i32 = arith.constant 0 : i32
    %c0_i32_0 = arith.constant 0 : i32
    return %arg1, %arg0, %c0_i32 : i32, i32, i32
  }
}

module attributes {stable_mosaic.version = 11 : i64} {
  func.func @_attn_oproj_kernel(%arg0: i32, %arg1: i32, %arg2: memref<1x16x8xbf16, #tpu.memory_space<vmem>>, %arg3: memref<1x16x8xbf16, #tpu.memory_space<vmem>>, %arg4: memref<1x16x8xbf16, #tpu.memory_space<vmem>>, %arg5: memref<1x8x32xbf16, #tpu.memory_space<vmem>>, %arg6: memref<1x32xf32, #tpu.memory_space<vmem>>, %arg7: memref<16x32xbf16, #tpu.memory_space<vmem>>, %arg8: memref<16x32xbf16, #tpu.memory_space<vmem>>, %arg9: memref<16x32xf32, #tpu.memory_space<vmem>>) attributes {dimension_semantics = [#tpu.dimension_semantics<parallel>, #tpu.dimension_semantics<arbitrary>], iteration_bounds = array<i64: 2, 4>, scalar_prefetch = 0 : i64, scratch_operands = 1 : i64, tpu.core_type = #tpu.core_type<tc>, window_params = [{transform_indices = @transform_0, window_bounds = array<i64: 1, 16, 8>}, {transform_indices = @transform_1, window_bounds = array<i64: 1, 16, 8>}, {transform_indices = @transform_2, window_bounds = array<i64: 1, 16, 8>}, {transform_indices = @transform_3, window_bounds = array<i64: 1, 8, 32>}, {pipeline_mode = #tpu.pipeline_mode<synchronous>, transform_indices = @transform_4, window_bounds = array<i64: 1, 32>}, {transform_indices = @transform_5, window_bounds = array<i64: 16, 32>}, {transform_indices = @transform_6, window_bounds = array<i64: 16, 32>}]} {
    %c0_i32 = arith.constant 0 : i32
    %0 = arith.cmpi eq, %arg1, %c0_i32 : i32
    %1 = arith.extui %0 : i1 to i32
    %c0_i32_0 = arith.constant 0 : i32
    %2 = arith.cmpi ne, %1, %c0_i32_0 : i32
    scf.if %2 {
      %cst_22 = arith.constant 0.000000e+00 : f32
      %35 = vector.broadcast %cst_22 : f32 to vector<16x32xf32>
      %c0_23 = arith.constant 0 : index
      %c0_24 = arith.constant 0 : index
      %36 = vector.load %arg9[%c0_23, %c0_24] : memref<16x32xf32, #tpu.memory_space<vmem>>, vector<16x32xf32>
      tpu.vector_store %arg9[%c0_23, %c0_24], %35 {strides = array<i32>} : memref<16x32xf32, #tpu.memory_space<vmem>>, vector<16x32xf32>,
    } else {
    }
    %c0 = arith.constant 0 : index
    %c0_1 = arith.constant 0 : index
    %c0_2 = arith.constant 0 : index
    %3 = vector.load %arg2[%c0, %c0_1, %c0_2] : memref<1x16x8xbf16, #tpu.memory_space<vmem>>, vector<1x16x8xbf16>
    %4 = vector.shape_cast %3 : vector<1x16x8xbf16> to vector<16x8xbf16>
    %5 = arith.extf %4 : vector<16x8xbf16> to vector<16x8xf32>
    %cst = arith.constant 0.353553385 : f32
    %6 = vector.broadcast %cst : f32 to vector<16x8xf32>
    %7 = arith.mulf %5, %6 : vector<16x8xf32>
    %8 = arith.truncf %7 : vector<16x8xf32> to vector<16x8xbf16>
    %c0_3 = arith.constant 0 : index
    %c0_4 = arith.constant 0 : index
    %c0_5 = arith.constant 0 : index
    %9 = vector.load %arg3[%c0_3, %c0_4, %c0_5] : memref<1x16x8xbf16, #tpu.memory_space<vmem>>, vector<1x16x8xbf16>
    %10 = vector.shape_cast %9 : vector<1x16x8xbf16> to vector<16x8xbf16>
    %cst_6 = arith.constant dense<0.000000e+00> : vector<16x16xf32>
    %11 = tpu.matmul %8, %10, %cst_6 {dimension_numbers = #tpu.dot_dimension_numbers<[1], [1], [0], [0], [0, 0, 1, 0], [], []>} : vector<16x8xbf16>, vector<16x8xbf16>, vector<16x16xf32> -> vector<16x16xf32>
    %cst_7 = arith.constant dense<0xFF800000> : vector<16xf32>
    %12 = vector.multi_reduction <maximumf>, %11, %cst_7 [1] : vector<16x16xf32> to vector<16xf32>
    %13 = vector.shape_cast %12 : vector<16xf32> to vector<16x1xf32>
    %14 = vector.broadcast %13 : vector<16x1xf32> to vector<16x16xf32>
    %15 = arith.subf %11, %14 : vector<16x16xf32>
    %16 = math.exp %15 : vector<16x16xf32>
    %cst_8 = arith.constant dense<0.000000e+00> : vector<16xf32>
    %17 = vector.multi_reduction <add>, %16, %cst_8 [1] : vector<16x16xf32> to vector<16xf32>
    %18 = vector.shape_cast %17 : vector<16xf32> to vector<16x1xf32>
    %19 = vector.broadcast %18 : vector<16x1xf32> to vector<16x16xf32>
    %20 = arith.divf %16, %19 : vector<16x16xf32>
    %21 = arith.truncf %20 : vector<16x16xf32> to vector<16x16xbf16>
    %c0_9 = arith.constant 0 : index
    %c0_10 = arith.constant 0 : index
    %c0_11 = arith.constant 0 : index
    %22 = vector.load %arg4[%c0_9, %c0_10, %c0_11] : memref<1x16x8xbf16, #tpu.memory_space<vmem>>, vector<1x16x8xbf16>
    %23 = vector.shape_cast %22 : vector<1x16x8xbf16> to vector<16x8xbf16>
    %cst_12 = arith.constant dense<0.000000e+00> : vector<16x8xf32>
    %24 = tpu.matmul %21, %23, %cst_12 {dimension_numbers = #tpu.dot_dimension_numbers<[1], [0], [0], [1], [0, 0, 1, 1], [], []>} : vector<16x16xbf16>, vector<16x8xbf16>, vector<16x8xf32> -> vector<16x8xf32>
    %c0_13 = arith.constant 0 : index
    %c0_14 = arith.constant 0 : index
    %25 = vector.load %arg9[%c0_13, %c0_14] : memref<16x32xf32, #tpu.memory_space<vmem>>, vector<16x32xf32>
    %26 = arith.truncf %24 : vector<16x8xf32> to vector<16x8xbf16>
    %c0_15 = arith.constant 0 : index
    %c0_16 = arith.constant 0 : index
    %c0_17 = arith.constant 0 : index
    %27 = vector.load %arg5[%c0_15, %c0_16, %c0_17] : memref<1x8x32xbf16, #tpu.memory_space<vmem>>, vector<1x8x32xbf16>
    %28 = vector.shape_cast %27 : vector<1x8x32xbf16> to vector<8x32xbf16>
    %cst_18 = arith.constant dense<0.000000e+00> : vector<16x32xf32>
    %29 = tpu.matmul %26, %28, %cst_18 {dimension_numbers = #tpu.dot_dimension_numbers<[1], [0], [0], [1], [0, 0, 1, 1], [], []>} : vector<16x8xbf16>, vector<8x32xbf16>, vector<16x32xf32> -> vector<16x32xf32>
    %30 = arith.addf %25, %29 : vector<16x32xf32>
    %c0_19 = arith.constant 0 : index
    %c0_20 = arith.constant 0 : index
    %31 = vector.load %arg9[%c0_19, %c0_20] : memref<16x32xf32, #tpu.memory_space<vmem>>, vector<16x32xf32>
    tpu.vector_store %arg9[%c0_19, %c0_20], %30 {strides = array<i32>} : memref<16x32xf32, #tpu.memory_space<vmem>>, vector<16x32xf32>,
    %c3_i32 = arith.constant 3 : i32
    %32 = arith.cmpi eq, %arg1, %c3_i32 : i32
    %33 = arith.extui %32 : i1 to i32
    %c0_i32_21 = arith.constant 0 : i32
    %34 = arith.cmpi ne, %33, %c0_i32_21 : i32
    scf.if %34 {
      %c0_22 = arith.constant 0 : index
      %c0_23 = arith.constant 0 : index
      %35 = vector.load %arg9[%c0_22, %c0_23] : memref<16x32xf32, #tpu.memory_space<vmem>>, vector<16x32xf32>
      %c0_24 = arith.constant 0 : index
      %c0_25 = arith.constant 0 : index
      %36 = vector.load %arg6[%c0_24, %c0_25] : memref<1x32xf32, #tpu.memory_space<vmem>>, vector<1x32xf32>
      %37 = vector.broadcast %36 : vector<1x32xf32> to vector<16x32xf32>
      %38 = arith.addf %35, %37 : vector<16x32xf32>
      %c0_26 = arith.constant 0 : index
      %c0_27 = arith.constant 0 : index
      %39 = vector.load %arg7[%c0_26, %c0_27] : memref<16x32xbf16, #tpu.memory_space<vmem>>, vector<16x32xbf16>
      %40 = arith.extf %39 : vector<16x32xbf16> to vector<16x32xf32>
      %41 = arith.addf %38, %40 : vector<16x32xf32>
      %42 = arith.truncf %41 : vector<16x32xf32> to vector<16x32xbf16>
      %c0_28 = arith.constant 0 : index
      %c0_29 = arith.constant 0 : index
      %43 = vector.load %arg8[%c0_28, %c0_29] : memref<16x32xbf16, #tpu.memory_space<vmem>>, vector<16x32xbf16>
      tpu.vector_store %arg8[%c0_28, %c0_29], %42 {strides = array<i32>} : memref<16x32xbf16, #tpu.memory_space<vmem>>, vector<16x32xbf16>,
    } else {
    }
    return
  }
  func.func @transform_0(%arg0: i32, %arg1: i32) -> (i32, i32, i32) {
    %c0_i32 = arith.constant 0 : i32
    %c0_i32_0 = arith.constant 0 : i32
    return %arg1, %arg0, %c0_i32 : i32, i32, i32
  }
  func.func @transform_1(%arg0: i32, %arg1: i32) -> (i32, i32, i32) {
    %c4_i32 = arith.constant 4 : i32
    %0 = arith.addi %c4_i32, %arg1 : i32
    %c0_i32 = arith.constant 0 : i32
    %c0_i32_0 = arith.constant 0 : i32
    return %0, %arg0, %c0_i32 : i32, i32, i32
  }
  func.func @transform_2(%arg0: i32, %arg1: i32) -> (i32, i32, i32) {
    %c8_i32 = arith.constant 8 : i32
    %0 = arith.addi %c8_i32, %arg1 : i32
    %c0_i32 = arith.constant 0 : i32
    %c0_i32_0 = arith.constant 0 : i32
    return %0, %arg0, %c0_i32 : i32, i32, i32
  }
  func.func @transform_3(%arg0: i32, %arg1: i32) -> (i32, i32, i32) {
    %c0_i32 = arith.constant 0 : i32
    %c0_i32_0 = arith.constant 0 : i32
    %c0_i32_1 = arith.constant 0 : i32
    return %arg1, %c0_i32, %c0_i32_0 : i32, i32, i32
  }
  func.func @transform_4(%arg0: i32, %arg1: i32) -> (i32, i32) {
    %c0_i32 = arith.constant 0 : i32
    %c0_i32_0 = arith.constant 0 : i32
    %c0_i32_1 = arith.constant 0 : i32
    return %c0_i32, %c0_i32_0 : i32, i32
  }
  func.func @transform_5(%arg0: i32, %arg1: i32) -> (i32, i32) {
    %c0_i32 = arith.constant 0 : i32
    %c0_i32_0 = arith.constant 0 : i32
    return %arg0, %c0_i32 : i32, i32
  }
  func.func @transform_6(%arg0: i32, %arg1: i32) -> (i32, i32) {
    %c0_i32 = arith.constant 0 : i32
    %c0_i32_0 = arith.constant 0 : i32
    return %arg0, %c0_i32 : i32, i32
  }
}

module attributes {stable_mosaic.version = 11 : i64} {
  func.func @_ln_mlp_kernel(%arg0: i32, %arg1: i32, %arg2: memref<32x32xbf16, #tpu.memory_space<vmem>>, %arg3: memref<1x32xf32, #tpu.memory_space<vmem>>, %arg4: memref<1x32xf32, #tpu.memory_space<vmem>>, %arg5: memref<32x64xbf16, #tpu.memory_space<vmem>>, %arg6: memref<1x64xf32, #tpu.memory_space<vmem>>, %arg7: memref<32x64xbf16, #tpu.memory_space<vmem>>, %arg8: memref<32x32xbf16, #tpu.memory_space<vmem>>) attributes {dimension_semantics = [#tpu.dimension_semantics<parallel>, #tpu.dimension_semantics<arbitrary>], iteration_bounds = array<i64: 1, 1>, scalar_prefetch = 0 : i64, scratch_operands = 1 : i64, tpu.core_type = #tpu.core_type<tc>, window_params = [{transform_indices = @transform_0, window_bounds = array<i64: 32, 32>}, {pipeline_mode = #tpu.pipeline_mode<synchronous>, transform_indices = @transform_1, window_bounds = array<i64: 1, 32>}, {pipeline_mode = #tpu.pipeline_mode<synchronous>, transform_indices = @transform_2, window_bounds = array<i64: 1, 32>}, {transform_indices = @transform_3, window_bounds = array<i64: 32, 64>}, {transform_indices = @transform_4, window_bounds = array<i64: 1, 64>}, {transform_indices = @transform_5, window_bounds = array<i64: 32, 64>}]} {
    %c0_i32 = arith.constant 0 : i32
    %0 = arith.cmpi eq, %arg1, %c0_i32 : i32
    %1 = arith.extui %0 : i1 to i32
    %c0_i32_0 = arith.constant 0 : i32
    %2 = arith.cmpi ne, %1, %c0_i32_0 : i32
    scf.if %2 {
      %c0_12 = arith.constant 0 : index
      %c0_13 = arith.constant 0 : index
      %24 = vector.load %arg2[%c0_12, %c0_13] : memref<32x32xbf16, #tpu.memory_space<vmem>>, vector<32x32xbf16>
      %25 = arith.extf %24 : vector<32x32xbf16> to vector<32x32xf32>
      %cst_14 = arith.constant dense<0.000000e+00> : vector<32xf32>
      %26 = vector.multi_reduction <add>, %25, %cst_14 [1] : vector<32x32xf32> to vector<32xf32>
      %27 = vector.shape_cast %26 : vector<32xf32> to vector<32x1xf32>
      %cst_15 = arith.constant 3.200000e+01 : f32
      %28 = vector.broadcast %cst_15 : f32 to vector<32x1xf32>
      %29 = arith.divf %27, %28 : vector<32x1xf32>
      %30 = vector.broadcast %29 : vector<32x1xf32> to vector<32x32xf32>
      %31 = arith.subf %25, %30 : vector<32x32xf32>
      %32 = arith.mulf %31, %31 : vector<32x32xf32>
      %cst_16 = arith.constant dense<0.000000e+00> : vector<32xf32>
      %33 = vector.multi_reduction <add>, %32, %cst_16 [1] : vector<32x32xf32> to vector<32xf32>
      %34 = vector.shape_cast %33 : vector<32xf32> to vector<32x1xf32>
      %cst_17 = arith.constant 3.200000e+01 : f32
      %35 = vector.broadcast %cst_17 : f32 to vector<32x1xf32>
      %36 = arith.divf %34, %35 : vector<32x1xf32>
      %37 = vector.broadcast %29 : vector<32x1xf32> to vector<32x32xf32>
      %38 = arith.subf %25, %37 : vector<32x32xf32>
      %cst_18 = arith.constant 9.99999997E-7 : f32
      %39 = vector.broadcast %cst_18 : f32 to vector<32x1xf32>
      %40 = arith.addf %36, %39 : vector<32x1xf32>
      %41 = math.rsqrt %40 : vector<32x1xf32>
      %42 = vector.broadcast %41 : vector<32x1xf32> to vector<32x32xf32>
      %43 = arith.mulf %38, %42 : vector<32x32xf32>
      %c0_19 = arith.constant 0 : index
      %c0_20 = arith.constant 0 : index
      %44 = vector.load %arg3[%c0_19, %c0_20] : memref<1x32xf32, #tpu.memory_space<vmem>>, vector<1x32xf32>
      %45 = vector.broadcast %44 : vector<1x32xf32> to vector<32x32xf32>
      %46 = arith.mulf %43, %45 : vector<32x32xf32>
      %c0_21 = arith.constant 0 : index
      %c0_22 = arith.constant 0 : index
      %47 = vector.load %arg4[%c0_21, %c0_22] : memref<1x32xf32, #tpu.memory_space<vmem>>, vector<1x32xf32>
      %48 = vector.broadcast %47 : vector<1x32xf32> to vector<32x32xf32>
      %49 = arith.addf %46, %48 : vector<32x32xf32>
      %50 = arith.truncf %49 : vector<32x32xf32> to vector<32x32xbf16>
      %c0_23 = arith.constant 0 : index
      %c0_24 = arith.constant 0 : index
      %51 = vector.load %arg8[%c0_23, %c0_24] : memref<32x32xbf16, #tpu.memory_space<vmem>>, vector<32x32xbf16>
      tpu.vector_store %arg8[%c0_23, %c0_24], %50 {strides = array<i32>} : memref<32x32xbf16, #tpu.memory_space<vmem>>, vector<32x32xbf16>,
    } else {
    }
    %c0 = arith.constant 0 : index
    %c0_1 = arith.constant 0 : index
    %3 = vector.load %arg8[%c0, %c0_1] : memref<32x32xbf16, #tpu.memory_space<vmem>>, vector<32x32xbf16>
    %c0_2 = arith.constant 0 : index
    %c0_3 = arith.constant 0 : index
    %4 = vector.load %arg5[%c0_2, %c0_3] : memref<32x64xbf16, #tpu.memory_space<vmem>>, vector<32x64xbf16>
    %cst = arith.constant dense<0.000000e+00> : vector<32x64xf32>
    %5 = tpu.matmul %3, %4, %cst {dimension_numbers = #tpu.dot_dimension_numbers<[1], [0], [0], [1], [0, 0, 1, 1], [], []>} : vector<32x32xbf16>, vector<32x64xbf16>, vector<32x64xf32> -> vector<32x64xf32>
    %c0_4 = arith.constant 0 : index
    %c0_5 = arith.constant 0 : index
    %6 = vector.load %arg6[%c0_4, %c0_5] : memref<1x64xf32, #tpu.memory_space<vmem>>, vector<1x64xf32>
    %7 = vector.broadcast %6 : vector<1x64xf32> to vector<32x64xf32>
    %8 = arith.addf %5, %7 : vector<32x64xf32>
    %cst_6 = arith.constant 5.000000e-01 : f32
    %9 = vector.broadcast %cst_6 : f32 to vector<32x64xf32>
    %10 = arith.mulf %9, %8 : vector<32x64xf32>
    %11 = arith.mulf %8, %8 : vector<32x64xf32>
    %12 = arith.mulf %11, %8 : vector<32x64xf32>
    %cst_7 = arith.constant 4.471500e-02 : f32
    %13 = vector.broadcast %cst_7 : f32 to vector<32x64xf32>
    %14 = arith.mulf %13, %12 : vector<32x64xf32>
    %15 = arith.addf %8, %14 : vector<32x64xf32>
    %cst_8 = arith.constant 0.797884583 : f32
    %16 = vector.broadcast %cst_8 : f32 to vector<32x64xf32>
    %17 = arith.mulf %16, %15 : vector<32x64xf32>
    %18 = math.tanh %17 : vector<32x64xf32>
    %cst_9 = arith.constant 1.000000e+00 : f32
    %19 = vector.broadcast %cst_9 : f32 to vector<32x64xf32>
    %20 = arith.addf %19, %18 : vector<32x64xf32>
    %21 = arith.mulf %10, %20 : vector<32x64xf32>
    %22 = arith.truncf %21 : vector<32x64xf32> to vector<32x64xbf16>
    %c0_10 = arith.constant 0 : index
    %c0_11 = arith.constant 0 : index
    %23 = vector.load %arg7[%c0_10, %c0_11] : memref<32x64xbf16, #tpu.memory_space<vmem>>, vector<32x64xbf16>
    tpu.vector_store %arg7[%c0_10, %c0_11], %22 {strides = array<i32>} : memref<32x64xbf16, #tpu.memory_space<vmem>>, vector<32x64xbf16>,
    return
  }
  func.func @transform_0(%arg0: i32, %arg1: i32) -> (i32, i32) {
    %c0_i32 = arith.constant 0 : i32
    %c0_i32_0 = arith.constant 0 : i32
    return %arg0, %c0_i32 : i32, i32
  }
  func.func @transform_1(%arg0: i32, %arg1: i32) -> (i32, i32) {
    %c0_i32 = arith.constant 0 : i32
    %c0_i32_0 = arith.constant 0 : i32
    %c0_i32_1 = arith.constant 0 : i32
    return %c0_i32, %c0_i32_0 : i32, i32
  }
  func.func @transform_2(%arg0: i32, %arg1: i32) -> (i32, i32) {
    %c0_i32 = arith.constant 0 : i32
    %c0_i32_0 = arith.constant 0 : i32
    %c0_i32_1 = arith.constant 0 : i32
    return %c0_i32, %c0_i32_0 : i32, i32
  }
  func.func @transform_3(%arg0: i32, %arg1: i32) -> (i32, i32) {
    %c0_i32 = arith.constant 0 : i32
    %c0_i32_0 = arith.constant 0 : i32
    return %c0_i32, %arg1 : i32, i32
  }
  func.func @transform_4(%arg0: i32, %arg1: i32) -> (i32, i32) {
    %c0_i32 = arith.constant 0 : i32
    %c0_i32_0 = arith.constant 0 : i32
    return %c0_i32, %arg1 : i32, i32
  }
  func.func @transform_5(%arg0: i32, %arg1: i32) -> (i32, i32) {
    %c0_i32 = arith.constant 0 : i32
    return %arg0, %arg1 : i32, i32
  }
}

module attributes {stable_mosaic.version = 11 : i64} {
  func.func @_matmul_res_kernel(%arg0: i32, %arg1: memref<32x64xbf16, #tpu.memory_space<vmem>>, %arg2: memref<64x32xbf16, #tpu.memory_space<vmem>>, %arg3: memref<1x32xf32, #tpu.memory_space<vmem>>, %arg4: memref<32x32xbf16, #tpu.memory_space<vmem>>, %arg5: memref<32x32xbf16, #tpu.memory_space<vmem>>) attributes {dimension_semantics = [#tpu.dimension_semantics<parallel>], iteration_bounds = array<i64: 1>, scalar_prefetch = 0 : i64, scratch_operands = 0 : i64, tpu.core_type = #tpu.core_type<tc>, window_params = [{transform_indices = @transform_0, window_bounds = array<i64: 32, 64>}, {pipeline_mode = #tpu.pipeline_mode<synchronous>, transform_indices = @transform_1, window_bounds = array<i64: 64, 32>}, {pipeline_mode = #tpu.pipeline_mode<synchronous>, transform_indices = @transform_2, window_bounds = array<i64: 1, 32>}, {transform_indices = @transform_3, window_bounds = array<i64: 32, 32>}, {transform_indices = @transform_4, window_bounds = array<i64: 32, 32>}]} {
    %c0 = arith.constant 0 : index
    %c0_0 = arith.constant 0 : index
    %0 = vector.load %arg1[%c0, %c0_0] : memref<32x64xbf16, #tpu.memory_space<vmem>>, vector<32x64xbf16>
    %c0_1 = arith.constant 0 : index
    %c0_2 = arith.constant 0 : index
    %1 = vector.load %arg2[%c0_1, %c0_2] : memref<64x32xbf16, #tpu.memory_space<vmem>>, vector<64x32xbf16>
    %cst = arith.constant dense<0.000000e+00> : vector<32x32xf32>
    %2 = tpu.matmul %0, %1, %cst {dimension_numbers = #tpu.dot_dimension_numbers<[1], [0], [0], [1], [0, 0, 1, 1], [], []>} : vector<32x64xbf16>, vector<64x32xbf16>, vector<32x32xf32> -> vector<32x32xf32>
    %c0_3 = arith.constant 0 : index
    %c0_4 = arith.constant 0 : index
    %3 = vector.load %arg3[%c0_3, %c0_4] : memref<1x32xf32, #tpu.memory_space<vmem>>, vector<1x32xf32>
    %4 = vector.broadcast %3 : vector<1x32xf32> to vector<32x32xf32>
    %5 = arith.addf %2, %4 : vector<32x32xf32>
    %c0_5 = arith.constant 0 : index
    %c0_6 = arith.constant 0 : index
    %6 = vector.load %arg4[%c0_5, %c0_6] : memref<32x32xbf16, #tpu.memory_space<vmem>>, vector<32x32xbf16>
    %7 = arith.extf %6 : vector<32x32xbf16> to vector<32x32xf32>
    %8 = arith.addf %5, %7 : vector<32x32xf32>
    %9 = arith.truncf %8 : vector<32x32xf32> to vector<32x32xbf16>
    %c0_7 = arith.constant 0 : index
    %c0_8 = arith.constant 0 : index
    %10 = vector.load %arg5[%c0_7, %c0_8] : memref<32x32xbf16, #tpu.memory_space<vmem>>, vector<32x32xbf16>
    tpu.vector_store %arg5[%c0_7, %c0_8], %9 {strides = array<i32>} : memref<32x32xbf16, #tpu.memory_space<vmem>>, vector<32x32xbf16>,
    return
  }
  func.func @transform_0(%arg0: i32) -> (i32, i32) {
    %c0_i32 = arith.constant 0 : i32
    %c0_i32_0 = arith.constant 0 : i32
    return %arg0, %c0_i32 : i32, i32
  }
  func.func @transform_1(%arg0: i32) -> (i32, i32) {
    %c0_i32 = arith.constant 0 : i32
    %c0_i32_0 = arith.constant 0 : i32
    %c0_i32_1 = arith.constant 0 : i32
    return %c0_i32, %c0_i32_0 : i32, i32
  }
  func.func @transform_2(%arg0: i32) -> (i32, i32) {
    %c0_i32 = arith.constant 0 : i32
    %c0_i32_0 = arith.constant 0 : i32
    %c0_i32_1 = arith.constant 0 : i32
    return %c0_i32, %c0_i32_0 : i32, i32
  }
  func.func @transform_3(%arg0: i32) -> (i32, i32) {
    %c0_i32 = arith.constant 0 : i32
    %c0_i32_0 = arith.constant 0 : i32
    return %arg0, %c0_i32 : i32, i32
  }
  func.func @transform_4(%arg0: i32) -> (i32, i32) {
    %c0_i32 = arith.constant 0 : i32
    %c0_i32_0 = arith.constant 0 : i32
    return %arg0, %c0_i32 : i32, i32
  }
}

module attributes {stable_mosaic.version = 11 : i64} {
  func.func @_layernorm_kernel(%arg0: i32, %arg1: memref<32x32xbf16, #tpu.memory_space<vmem>>, %arg2: memref<1x32xf32, #tpu.memory_space<vmem>>, %arg3: memref<1x32xf32, #tpu.memory_space<vmem>>, %arg4: memref<32x32xf32, #tpu.memory_space<vmem>>) attributes {dimension_semantics = [#tpu.dimension_semantics<parallel>], iteration_bounds = array<i64: 1>, scalar_prefetch = 0 : i64, scratch_operands = 0 : i64, tpu.core_type = #tpu.core_type<tc>, window_params = [{transform_indices = @transform_0, window_bounds = array<i64: 32, 32>}, {pipeline_mode = #tpu.pipeline_mode<synchronous>, transform_indices = @transform_1, window_bounds = array<i64: 1, 32>}, {pipeline_mode = #tpu.pipeline_mode<synchronous>, transform_indices = @transform_2, window_bounds = array<i64: 1, 32>}, {transform_indices = @transform_3, window_bounds = array<i64: 32, 32>}]} {
    %c0 = arith.constant 0 : index
    %c0_0 = arith.constant 0 : index
    %0 = vector.load %arg1[%c0, %c0_0] : memref<32x32xbf16, #tpu.memory_space<vmem>>, vector<32x32xbf16>
    %1 = arith.extf %0 : vector<32x32xbf16> to vector<32x32xf32>
    %cst = arith.constant dense<0.000000e+00> : vector<32xf32>
    %2 = vector.multi_reduction <add>, %1, %cst [1] : vector<32x32xf32> to vector<32xf32>
    %3 = vector.shape_cast %2 : vector<32xf32> to vector<32x1xf32>
    %cst_1 = arith.constant 3.200000e+01 : f32
    %4 = vector.broadcast %cst_1 : f32 to vector<32x1xf32>
    %5 = arith.divf %3, %4 : vector<32x1xf32>
    %6 = vector.broadcast %5 : vector<32x1xf32> to vector<32x32xf32>
    %7 = arith.subf %1, %6 : vector<32x32xf32>
    %8 = arith.mulf %7, %7 : vector<32x32xf32>
    %cst_2 = arith.constant dense<0.000000e+00> : vector<32xf32>
    %9 = vector.multi_reduction <add>, %8, %cst_2 [1] : vector<32x32xf32> to vector<32xf32>
    %10 = vector.shape_cast %9 : vector<32xf32> to vector<32x1xf32>
    %cst_3 = arith.constant 3.200000e+01 : f32
    %11 = vector.broadcast %cst_3 : f32 to vector<32x1xf32>
    %12 = arith.divf %10, %11 : vector<32x1xf32>
    %13 = vector.broadcast %5 : vector<32x1xf32> to vector<32x32xf32>
    %14 = arith.subf %1, %13 : vector<32x32xf32>
    %cst_4 = arith.constant 9.99999997E-7 : f32
    %15 = vector.broadcast %cst_4 : f32 to vector<32x1xf32>
    %16 = arith.addf %12, %15 : vector<32x1xf32>
    %17 = math.rsqrt %16 : vector<32x1xf32>
    %18 = vector.broadcast %17 : vector<32x1xf32> to vector<32x32xf32>
    %19 = arith.mulf %14, %18 : vector<32x32xf32>
    %c0_5 = arith.constant 0 : index
    %c0_6 = arith.constant 0 : index
    %20 = vector.load %arg2[%c0_5, %c0_6] : memref<1x32xf32, #tpu.memory_space<vmem>>, vector<1x32xf32>
    %21 = vector.broadcast %20 : vector<1x32xf32> to vector<32x32xf32>
    %22 = arith.mulf %19, %21 : vector<32x32xf32>
    %c0_7 = arith.constant 0 : index
    %c0_8 = arith.constant 0 : index
    %23 = vector.load %arg3[%c0_7, %c0_8] : memref<1x32xf32, #tpu.memory_space<vmem>>, vector<1x32xf32>
    %24 = vector.broadcast %23 : vector<1x32xf32> to vector<32x32xf32>
    %25 = arith.addf %22, %24 : vector<32x32xf32>
    %c0_9 = arith.constant 0 : index
    %c0_10 = arith.constant 0 : index
    %26 = vector.load %arg4[%c0_9, %c0_10] : memref<32x32xf32, #tpu.memory_space<vmem>>, vector<32x32xf32>
    tpu.vector_store %arg4[%c0_9, %c0_10], %25 {strides = array<i32>} : memref<32x32xf32, #tpu.memory_space<vmem>>, vector<32x32xf32>,
    return
  }
  func.func @transform_0(%arg0: i32) -> (i32, i32) {
    %c0_i32 = arith.constant 0 : i32
    %c0_i32_0 = arith.constant 0 : i32
    return %arg0, %c0_i32 : i32, i32
  }
  func.func @transform_1(%arg0: i32) -> (i32, i32) {
    %c0_i32 = arith.constant 0 : i32
    %c0_i32_0 = arith.constant 0 : i32
    %c0_i32_1 = arith.constant 0 : i32
    return %c0_i32, %c0_i32_0 : i32, i32
  }
  func.func @transform_2(%arg0: i32) -> (i32, i32) {
    %c0_i32 = arith.constant 0 : i32
    %c0_i32_0 = arith.constant 0 : i32
    %c0_i32_1 = arith.constant 0 : i32
    return %c0_i32, %c0_i32_0 : i32, i32
  }
  func.func @transform_3(%arg0: i32) -> (i32, i32) {
    %c0_i32 = arith.constant 0 : i32
    %c0_i32_0 = arith.constant 0 : i32
    return %arg0, %c0_i32 : i32, i32
  }
}

</mosaic_0001>

<bundles_post_ra>
// kernel: siglip_vision_model.10
= control target key start
LH: loop header
LB: loop body
LE: loop exit
PB: predicated region body
PF: predicated region fallthrough
CT: control target
= control target key end

     0   :  { %s526_s15 = smov 0   ;;  %s592_s0 = inlined_call_operand.vmem [shape: bf16[32,192], index: 0, kind: input, shape index: {}]   ;;  %s593_s1 = inlined_call_operand.vmem [shape: bf16[192,32], index: 1, kind: input, shape index: {}]   ;;  %s594_s2 = inlined_call_operand.vmem [shape: f32[1,32], index: 2, kind: input, shape index: {}]   ;;  %s595_s3 = inlined_call_operand.vmem [shape: f32[16,32], index: 3, kind: input, shape index: {}]   ;;  %s596_s4 = inlined_call_operand.vmem [shape: bf16[32,32], index: 4, kind: output, shape index: {}]  }
   0x1 LB: > { %s435_s16 = sadd.s32 4294967295, %s498_s15   ;;  %p439_p0 = scmp.ge.s32.totalorder %s498_s15, 1  ;;  %s498_s15 = sphi %s526_s15, %s14_s15  }
   0x2   : > { %p164_p1 = scmp.lt.s32.totalorder %s498_s15, 3 }
   0x4   : > { %p165_p2 = pnand %p439_p0, %p164_p1 }
   0x5   : > { %v477_v0 = vld [vmem:[%s593_s1] sm:$0xff] (!%p165_p2)   ;;  %v500_v1 = vmov (!%p165_p2), 0   ;;  %s440_s19 = sshll.u32 (!%p165_p2), %s435_s16, 1  ;;  %v478_v2 = vld [vmem:[%s593_s1 + $0x8] sm:$0xff] (!%p165_p2)   ;;  %v479_v3 = vld [vmem:[%s593_s1 + $0x10] sm:$0xff] (!%p165_p2)   ;;  %vm319_vm0 = vcmask (!%p165_p2), 523264  }
   0x6   : > { %168 = sbr.rel (%p165_p2) target bundleno = 275 (0x113), region = 36  ;;  %323 = vmatprep.subr.bf16.mxu0 (!%p165_p2), %v500_v1  ;;  %p192_p3 = scmp.lt.s32.totalorder (!%p165_p2), %s440_s19, 3  ;;  %v480_v4 = vld [vmem:[%s593_s1 + $0x18] sm:$0xff] (!%p165_p2)   ;;  %v481_v6 = vld [vmem:[%s593_s1 + $0x20] sm:$0xff] (!%p165_p2)   ;;  %v482_v7 = vld [vmem:[%s593_s1 + $0x28] sm:$0xff] (!%p165_p2)   ;;  %vm376_vm1 = vcmask (!%p165_p2), 257024  }
   0x7   : > { %324 = vmatpush1.bf16.msra.mxu0 (!%p165_p2), %v477_v0  ;;  %v483_v8 = vld [vmem:[%s593_s1 + $0x30] sm:$0xff] (!%p165_p2)   ;;  %v484_v9 = vld [vmem:[%s593_s1 + $0x38] sm:$0xff] (!%p165_p2)   ;;  %v485_v10 = vld [vmem:[%s593_s1 + $0x40] sm:$0xff] (!%p165_p2)  }
   0x8   : > { %325 = vmatprep.subr.bf16.mxu0 (!%p165_p2), %v500_v1  ;;  %v486_v11 = vld [vmem:[%s593_s1 + $0x48] sm:$0xff] (!%p165_p2)   ;;  %v487_v12 = vld [vmem:[%s593_s1 + $0x50] sm:$0xff] (!%p165_p2)   ;;  %v488_v13 = vld [vmem:[%s593_s1 + $0x58] sm:$0xff] (!%p165_p2)  }
   0x9   : > { %v445_v15 = vld [vmem:[%s594_s2] ss:$0 sm:$0xff] (!%p165_p2)  ;;  %v365_v21 = vld [vmem:[%s595_s3 + $0x8] sm:$0xff] (!%p165_p2) }
   0xa   : > { %v364_v17 = vld [vmem:[%s595_s3] sm:$0xff] (!%p165_p2) }
   0xb   : > { %326 = vmatpush1.bf16.msra.mxu0 (!%p165_p2), %v478_v2 }
   0xc   : > { %327 = vmatprep.subr.bf16.mxu0 (!%p165_p2), %v500_v1 }
   0xd   : > { %s598_s19 = smov (!%p192_p3, %s440_s19), 3 }
   0xe   : > { %s465_s24 = sshll.u32 %s598_s19, 3  ;;  %s444_s26 = sshll.u32 %s598_s19, 2 }
   0xf   : > { %328 = vmatpush1.bf16.msra.mxu0 %v479_v3  ;;  %s196_s29 = scalar_lea.vmem %s592_s0, %s465_s24  ;;  %s202_s5 = scalar_lea.vmem %s596_s4, %s444_s26 }
  0x10   : > { %329 = vmatprep.subr.bf16.mxu0 %v500_v1  ;;  %v491_v5 = vld [vmem:[%s196_s29 + $0x4] ss:$8 sps:$4 sm:$0xff]   ;;  %v489_v14 = vld [vmem:[%s196_s29] ss:$8 sps:$4 sm:$0xff]  }
  0x11   : > { %460 = vmatprep.mubr.msk.bf16.mxu0 %vm319_vm0, %v491_v5 }
  0x13   : > { %330 = vmatpush1.bf16.msra.mxu0 %v480_v4 }
  0x14   : > { %331 = vmatprep.subr.bf16.mxu0 %v500_v1 }
  0x17   : > { %332 = vmatpush1.bf16.msra.mxu0 %v481_v6 }
  0x18   : > { %333 = vmatprep.subr.bf16.mxu0 %v500_v1 }
  0x1b   : > { %334 = vmatpush1.bf16.msra.mxu0 %v482_v7 }
  0x1c   : > { %335 = vmatprep.subr.bf16.mxu0 %v500_v1 }
  0x1f   : > { %336 = vmatpush1.bf16.msra.mxu0 %v483_v8 }
  0x20   : > { %337 = vmatprep.subr.bf16.mxu0 %v500_v1 }
  0x23   : > { %338 = vmatpush1.bf16.msra.mxu0 %v484_v9 }
  0x24   : > { %339 = vmatprep.subr.bf16.mxu0 %v500_v1 }
  0x27   : > { %340 = vmatpush1.bf16.msra.mxu0 %v485_v10 }
  0x28   : > { %341 = vmatprep.subr.bf16.mxu0 %v500_v1 }
  0x2b   : > { %342 = vmatpush1.bf16.msra.mxu0 %v486_v11 }
  0x2c   : > { %343 = vmatprep.subr.bf16.mxu0 %v500_v1 }
  0x2f   : > { %344 = vmatpush1.bf16.msra.mxu0 %v487_v12 }
  0x30   : > { %345 = vmatprep.subr.bf16.mxu0 %v500_v1 }
  0x33   : > { %346 = vmatpush1.bf16.msra.mxu0 %v488_v13 }
  0x36   : > { %356 = vmatmul.mubr.bf16.vlgmr.msra.gmra.mrb[0].mxu0 %v489_v14 }
 0x109   : > { %v357_v16 = vpop.f32.mrb[0].mxu0 }
 0x10a   : > { %v358_v18 = vadd.f32 %v445_v15, %v357_v16  ;;  %v359_v19 = vpop.f32.mrb[1].mxu0 }
 0x10b   : > { %v360_v20 = vpop.f32.mrb[2].mxu0 }
 0x10c   : > { %v366_v22 = vadd.f32 %v364_v17, %v358_v18  ;;  %v361_v23 = vadd.f32 %v445_v15, %v360_v20  ;;  %v362_v24 = vpop.f32.mrb[3].mxu0 }
 0x10e   : > { %v466_v25 = vpack.c.bf16 %v366_v22, %v366_v22  ;;  %v367_v26 = vadd.f32 %v365_v21, %v361_v23 }
 0x110   : > { %377 = vst.msk [vmem:[%s202_s5] sm:$0xf] %vm376_vm1, %v466_v25  ;;  %v467_v27 = vpack.c.bf16 %v367_v26, %v367_v26 }
 0x112   : > { %378 = vst.msk [vmem:[%s202_s5 + $0x4] sm:$0xf] %vm376_vm1, %v467_v27 }
 0x113 PF: > { %s14_s15 = sadd.s32 1, %s498_s15  }
 0x114   : > { %p11_p4 = scmp.ge.s32.totalorder %s14_s15, 4  }
 0x116   :  { %13 = sbr.rel (!%p11_p4) target bundleno = 1 (0x1), region = 66 }

// kernel: siglip_vision_model.11
= control target key start
LH: loop header
LB: loop body
LE: loop exit
PB: predicated region body
PF: predicated region fallthrough
CT: control target
= control target key end

     0   :  { %s723_s18 = smov 0   ;;  %s725_s19 = smov 0   ;;  %s800_s0 = inlined_call_operand.vmem [shape: bf16[32,32], index: 0, kind: input, shape index: {}]   ;;  %s801_s1 = inlined_call_operand.vmem [shape: f32[1,32], index: 1, kind: input, shape index: {}]   ;;  %s802_s2 = inlined_call_operand.vmem [shape: f32[1,32], index: 2, kind: input, shape index: {}]   ;;  %s803_s3 = inlined_call_operand.vmem [shape: bf16[12,32,8], index: 3, kind: input, shape index: {}]   ;;  %s804_s4 = inlined_call_operand.vmem [shape: f32[12,1,8], index: 4, kind: input, shape index: {}]   ;;  %s805_s5 = inlined_call_operand.vmem [shape: bf16[12,32,8], index: 5, kind: output, shape index: {}]  }
   0x1   :  { %s727_s20 = smov 0  }
   0x2 LB: > { %s24_s21 = sadd.s32 1, %s687_s19  ;;  %p589_p0 = scmp.ge.s32.totalorder %s691_s20, 1  ;;  %s691_s20 = sphi %s727_s20, %s15_s20   ;;  %s687_s19 = sphi %s725_s19, %s807_s19   ;;  %s683_s18 = sphi %s723_s18, %s806_s18  }
   0x3   : > { %p25_p1 = scmp.ge.s32.totalorder %s24_s21, 12  ;;  %p220_p2 = scmp.lt.s32.totalorder %s691_s20, 13 }
   0x5   : > { %s809_s21 = smov (%p25_p1, %s24_s21), 0  ;;  %p221_p3 = pnand %p589_p0, %p220_p2 }
   0x6   : > { %p266_p4 = scmp.lt.s32.totalorder (!%p221_p3), %s683_s18, 11  ;;  %p594_p5 = scmp.ne.s32.totalorder (!%p221_p3), %s683_s18, 0 }
   0x7   : > { %224 = sbr.rel (%p221_p3) target bundleno = 571 (0x23b), region = 40 }
   0xe   : > { %s741_s22 = scalar_select %p266_p4, %s683_s18, 11 }
   0xf   : > { %288 = sbr.rel (%p594_p5) target bundleno = 342 (0x156), region = 44  ;;  %v615_v0 = vld [vmem:[%s800_s0] sm:$0xff] (!%p594_p5)   ;;  %vm297_vm0 = vcmask (!%p594_p5), 261120   ;;  %v622_v1 = vld [vmem:[%s800_s0 + $0x8] sm:$0xff] (!%p594_p5)  }
  0x10   : > { %s608_s23 = sshll.u32 %s741_s22, 4  ;;  %s273_s26 = scalar_lea.vmem %s804_s4, %s741_s22  ;;  %v616_v2 = vunpack.c.l.bf16 (!%p594_p5), %v615_v0  ;;  %v620_v3 = vunpack.c.l.bf16 (!%p594_p5), %v622_v1  ;;  %v617_v4 = vunpack.c.h.bf16 (!%p594_p5), %v615_v0  ;;  %v621_v5 = vunpack.c.h.bf16 (!%p594_p5), %v622_v1  ;;  %v595_v44 = vld [vmem:[%s801_s1] ss:$0 sm:$0xff] (!%p594_p5) }
  0x11   : > { %s751_s29 = scalar_lea.vmem %s803_s3, %s608_s23  ;;  %s756_s7 = scalar_lea.vmem %s805_s5, %s608_s23  ;;  %v596_v49 = vld [vmem:[%s802_s2] ss:$0 sm:$0xff] (!%p594_p5) }
  0x12   : > { %v298_v6 = vsel (!%p594_p5), %vm297_vm0, %v616_v2, 0.0  ;;  %v304_v7 = vsel (!%p594_p5), %vm297_vm0, %v620_v3, 0.0  ;;  %v301_v8 = vsel (!%p594_p5), %vm297_vm0, %v617_v4, 0.0  ;;  %v307_v9 = vsel (!%p594_p5), %vm297_vm0, %v621_v5, 0.0 }
  0x13   : > { %299 = vadd.xlane.f32.xlu0 (!%p594_p5), %v298_v6  ;;  %305 = vadd.xlane.f32.xlu1 (!%p594_p5), %v304_v7 }
  0x17   : > { %302 = vadd.xlane.f32.xlu0 %v301_v8  ;;  %308 = vadd.xlane.f32.xlu1 %v307_v9 }
  0xa0   : > { %v300_v10 = vpop.xlane.xlu0 %299  ;;  %v306_v11 = vpop.xlane.xlu1 %305 }
  0xa1   : > { %v311_v12 = vmul.f32 0.03125, %v300_v10  ;;  %v313_v13 = vmul.f32 0.03125, %v306_v11 }
  0xa3   : > { %v315_v14 = vsub.f32 %v616_v2, %v311_v12  ;;  %v317_v15 = vsub.f32 %v620_v3, %v313_v13 }
  0xa4   : > { %v303_v16 = vpop.xlane.xlu0 %302  ;;  %v309_v17 = vpop.xlane.xlu1 %308 }
  0xa5   : > { %v312_v18 = vmul.f32 0.03125, %v303_v16  ;;  %v314_v19 = vmul.f32 0.03125, %v309_v17  ;;  %v319_v20 = vmul.f32 %v315_v14, %v315_v14  ;;  %v321_v21 = vmul.f32 %v317_v15, %v317_v15 }
  0xa7   : > { %v316_v22 = vsub.f32 %v617_v4, %v312_v18  ;;  %v318_v23 = vsub.f32 %v621_v5, %v314_v19  ;;  %v323_v24 = vsel %vm297_vm0, %v319_v20, 0.0  ;;  %v329_v25 = vsel %vm297_vm0, %v321_v21, 0.0 }
  0xa8   : > { %324 = vadd.xlane.f32.xlu0 %v323_v24 }
  0xa9   : > { %v320_v26 = vmul.f32 %v316_v22, %v316_v22  ;;  %v322_v27 = vmul.f32 %v318_v23, %v318_v23 }
  0xab   : > { %v326_v28 = vsel %vm297_vm0, %v320_v26, 0.0  ;;  %v332_v29 = vsel %vm297_vm0, %v322_v27, 0.0 }
  0xac   : > { %330 = vadd.xlane.f32.xlu0 %v329_v25  ;;  %327 = vadd.xlane.f32.xlu1 %v326_v28 }
  0xb0   : > { %333 = vadd.xlane.f32.xlu1 %v332_v29 }
 0x135   : > { %v325_v30 = vpop.xlane.xlu0 %324 }
 0x136   : > { %v335_v31 = vmul.f32 0.03125, %v325_v30 }
 0x138   : > { %v339_v32 = vadd.f32 1e-06, %v335_v31 }
 0x139   : > { %v328_v33 = vpop.xlane.xlu1 %327  ;;  %v331_v34 = vpop.xlane.xlu0 %330 }
 0x13a   : > { %659 = vrsqrt.f32 %v339_v32  ;;  %v336_v35 = vmul.f32 0.03125, %v328_v33  ;;  %v337_v36 = vmul.f32 0.03125, %v331_v34 }
 0x13c   : > { %v340_v37 = vadd.f32 1e-06, %v336_v35  ;;  %v341_v38 = vadd.f32 1e-06, %v337_v36 }
 0x13d   : > { %v334_v39 = vpop.xlane.xlu1 %333 }
 0x13e   : > { %661 = vrsqrt.f32 %v340_v37  ;;  %v338_v40 = vmul.f32 0.03125, %v334_v39 }
 0x13f   : > { %663 = vrsqrt.f32 %v341_v38 }
 0x140   : > { %v342_v41 = vadd.f32 1e-06, %v338_v40 }
 0x142   : > { %665 = vrsqrt.f32 %v342_v41 }
 0x144   : > { %v660_v42 = vpop.eup %659 }
 0x145   : > { %v347_v43 = vmul.f32 %v660_v42, %v315_v14 }
 0x147   : > { %v358_v47 = vmul.f32 %v595_v44, %v347_v43 }
 0x148   : > { %v662_v45 = vpop.eup %661 }
 0x149   : > { %v664_v46 = vpop.eup %663  ;;  %v348_v48 = vmul.f32 %v662_v45, %v316_v22  ;;  %v369_v53 = vadd.f32 %v596_v49, %v358_v47 }
 0x14a   : > { %v349_v50 = vmul.f32 %v664_v46, %v317_v15 }
 0x14b   : > { %v359_v51 = vmul.f32 %v595_v44, %v348_v48 }
 0x14c   : > { %v666_v52 = vpop.eup %665  ;;  %v360_v55 = vmul.f32 %v595_v44, %v349_v50 }
 0x14d   : > { %v370_v54 = vadd.f32 %v596_v49, %v359_v51  ;;  %v350_v56 = vmul.f32 %v666_v52, %v318_v23 }
 0x14e   : > { %v371_v59 = vadd.f32 %v596_v49, %v360_v55 }
 0x14f   : > { %v373_v57 = vpack.c.bf16 %v370_v54, %v369_v53  ;;  %v361_v58 = vmul.f32 %v595_v44, %v350_v56 }
 0x151   : > { %375 = vst.msk [vmem:[#allocation2] sm:$0xff] %vm297_vm0, %v373_v57  ;;  %v372_v60 = vadd.f32 %v596_v49, %v361_v58 }
 0x153   : > { %v374_v61 = vpack.c.bf16 %v372_v60, %v371_v59 }
 0x155   : > { %376 = vst.msk [vmem:[#allocation2 + $0x8] sm:$0xff] %vm297_vm0, %v374_v61 }
 0x156 PF: > { %v667_v62 = vld [vmem:[%s751_s29] sm:$0xff]   ;;  %vm402_vm1 = vcmask 261120   ;;  %v668_v63 = vld [vmem:[%s751_s29 + $0x8] sm:$0xff]   ;;  %vm474_vm2 = vcmask 60416  }
 0x157   : > { %627 = vmatprep.subr.bf16.mxu0 %v667_v62  ;;  %v597_v2 = vld [vmem:[%s273_s26] ss:$0 sm:$0xff] }
 0x158   : > { %v377_v0 = vld [vmem:[#allocation2] sm:$0xff]  ;;  %628 = vmatpush3.bf16.msra.mxu0 %v667_v62 }
 0x159   : > { %631 = vmatprep.mubr.msk.bf16.mxu0 %vm402_vm1, %v377_v0  ;;  %629 = vmatprep.subr.bf16.mxu0 %v668_v63 }
 0x15c   : > { %630 = vmatpush3.bf16.msra.mxu0 %v668_v63  ;;  %v378_v1 = vld [vmem:[#allocation2 + $0x8] sm:$0xff] }
 0x15f   : > { %632 = vmatmul.mubr.msk.bf16.vlgmr.msra.gmra.mrb[0].mxu0 %vm402_vm1, %v378_v1 }
 0x232   : > { %v633_v3 = vpop.f32.mrb[0].mxu0 }
 0x233   : > { %v452_v4 = vadd.f32 %v633_v3, %v597_v2  ;;  %v443_v5 = vpop.f32.mrb[1].mxu0 }
 0x234   : > { %v444_v6 = vadd.f32 %v597_v2, %v443_v5  ;;  %v634_v7 = vpop.f32.mrb[2].mxu0 }
 0x235   : > { %v612_v8 = vpack.c.bf16 %v452_v4, %v452_v4  ;;  %v455_v9 = vadd.f32 %v634_v7, %v597_v2  ;;  %v446_v10 = vpop.f32.mrb[3].mxu0 }
 0x236   : > { %v610_v11 = vpack.c.bf16 %v444_v6, %v444_v6  ;;  %v447_v12 = vadd.f32 %v597_v2, %v446_v10 }
 0x237   : > { %477 = vst.msk [vmem:[%s756_s7 + $0x8] sm:$0xf] %vm474_vm2, %v612_v8  ;;  %v613_v13 = vpack.c.bf16 %v455_v9, %v455_v9 }
 0x238   : > { %475 = vst.msk [vmem:[%s756_s7] sm:$0xf] %vm474_vm2, %v610_v11  ;;  %v611_v14 = vpack.c.bf16 %v447_v12, %v447_v12 }
 0x239   : > { %478 = vst.msk [vmem:[%s756_s7 + $0xc] sm:$0xf] %vm474_vm2, %v613_v13 }
 0x23a   : > { %476 = vst.msk [vmem:[%s756_s7 + $0x4] sm:$0xf] %vm474_vm2, %v611_v14 }
 0x23b PF: > { %s15_s20 = sadd.s32 1, %s691_s20   ;;  %s806_s18 = smov %s687_s19 }
 0x23c   : > { %p12_p6 = scmp.ge.s32.totalorder %s15_s20, 14   ;;  %s807_s19 = smov %s809_s21 }
 0x23e   :  { %14 = sbr.rel (!%p12_p6) target bundleno = 2 (0x2), region = 80 }

// kernel: siglip_vision_model.12
= control target key start
LH: loop header
LB: loop body
LE: loop exit
PB: predicated region body
PF: predicated region fallthrough
CT: control target
= control target key end

     0   :  { %s971_s21 = smov 0   ;;  %s973_s22 = smov 0   ;;  %s1071_s0 = inlined_call_operand.vmem [shape: bf16[12,32,8], index: 0, kind: input, shape index: {}, may-alias: {0,1,2}]   ;;  %s1072_s1 = inlined_call_operand.vmem [shape: bf16[12,32,8], index: 1, kind: input, shape index: {}, may-alias: {0,1,2}]   ;;  %s1073_s2 = inlined_call_operand.vmem [shape: bf16[12,32,8], index: 2, kind: input, shape index: {}, may-alias: {0,1,2}]   ;;  %s1074_s3 = inlined_call_operand.vmem [shape: bf16[4,8,32], index: 3, kind: input, shape index: {}]   ;;  %s1075_s4 = inlined_call_operand.vmem [shape: f32[1,32], index: 4, kind: input, shape index: {}]   ;;  %s1076_s5 = inlined_call_operand.vmem [shape: bf16[32,32], index: 5, kind: input, shape index: {}]   ;;  %s1077_s6 = inlined_call_operand.vmem [shape: bf16[32,32], index: 6, kind: output, shape index: {}]  }
   0x1   :  { %s975_s23 = smov 0   ;;  %s977_s24 = smov 0  }
   0x2   :  { %s979_s25 = smov 0  }
   0x3 LB: > { %s25_s26 = sadd.s32 1, %s923_s23  ;;  %s28_s27 = sadd.s32 1, %s927_s24  ;;  %s931_s25 = sphi %s979_s25, %s16_s25   ;;  %s927_s24 = sphi %s977_s24, %s1085_s24   ;;  %s923_s23 = sphi %s975_s23, %s1084_s23   ;;  %s919_s22 = sphi %s973_s22, %s1083_s22   ;;  %s915_s21 = sphi %s971_s21, %s1082_s21  }
   0x4   : > { %p26_p0 = scmp.ge.s32.totalorder %s25_s26, 4  ;;  %p779_p1 = scmp.ge.s32.totalorder %s931_s25, 1 }
   0x5   : > { %p293_p2 = scmp.lt.s32.totalorder %s931_s25, 9 }
   0x6   : > { %s1087_s26 = smov (%p26_p0, %s25_s26), 0  ;;  %s1089_s27 = smov (!%p26_p0, %s28_s27), %s927_s24 }
   0x7   : > { %1078 = sst [smem:[#allocation3_spill]] %s1087_s26  ;;  %p294_p3 = pnand %p779_p1, %p293_p2 }
   0x8   : > { %p30_p4 = scmp.ge.s32.totalorder %s1089_s27, 2  ;;  %s780_s28 = sshll.u32 (!%p294_p3), %s919_s22, 1 }
   0x9   : > { %297 = sbr.rel (%p294_p3) target bundleno = 1023 (0x3ff), region = 44  ;;  %p357_p5 = scmp.lt.s32.totalorder (!%p294_p3), %s915_s21, 11 }
   0xa   : > { %s1091_s27 = smov (%p30_p4, %s1089_s27), 0  ;;  %p359_p6 = scmp.lt.s32.totalorder (!%p294_p3), %s780_s28, 3 }
   0xb   : > { %1079 = sst [smem:[#allocation4_spill]] %s1091_s27  ;;  %s366_s29 = sadd.s32 (!%p294_p3), 4, %s915_s21 }
   0xc   : > { %p368_p7 = scmp.lt.s32.totalorder (!%p294_p3), %s366_s29, 11  ;;  %s378_s9 = sadd.s32 (!%p294_p3), 8, %s915_s21 }
   0xd   : > { %p380_p8 = scmp.lt.s32.totalorder (!%p294_p3), %s378_s9, 11  ;;  %p390_p9 = scmp.lt.s32.totalorder (!%p294_p3), %s915_s21, 3 }
   0xe   : > { %p794_p10 = scmp.ne.s32.totalorder (!%p294_p3), %s915_s21, 0 }
  0x10   : > { %s358_s30 = scalar_select %p357_p5, %s915_s21, 11 }
  0x11   : > { %s1093_s28 = smov (!%p359_p6, %s780_s28), 3  ;;  %s1095_s29 = smov (!%p368_p7, %s366_s29), 11 }
  0x12   : > { %s781_s7 = sshll.u32 %s358_s30, 2  ;;  %s1097_s9 = smov (!%p380_p8, %s378_s9), 11  ;;  %vm411_vm0 = vcmask (!%p794_p10), 261120   ;;  %v933_v0 = vmov (!%p794_p10), 0.0  }
  0x13   : > { %s362_s8 = sadd.s32 %s781_s7, %s1093_s28  ;;  %s784_s14 = sshll.u32 %s1095_s29, 2  ;;  %412 = vst.msk [vmem:[#allocation2] sm:$0xff] (!%p794_p10), %vm411_vm0, %v933_v0  ;;  %413 = vst.msk [vmem:[#allocation2 + $0x8] sm:$0xff] (!%p794_p10), %vm411_vm0, %v933_v0 }
  0x14   : > { %s782_s10 = sshll.u32 %s362_s8, 2  ;;  %s791_s15 = sshll.u32 %s1093_s28, 2 }
  0x15   : > { %s364_s13 = scalar_lea.vmem %s1071_s0, %s782_s10  ;;  %s373_s16 = sadd.s32 %s784_s14, %s1093_s28 }
  0x16   : > { %s787_s17 = sshll.u32 %s1097_s9, 2  ;;  %s785_s18 = sshll.u32 %s373_s16, 2 }
  0x17   : > { %s385_s19 = sadd.s32 %s787_s17, %s1093_s28  ;;  %s375_s30 = scalar_lea.vmem %s1072_s1, %s785_s18 }
  0x18   : > { %s788_s7 = sshll.u32 %s385_s19, 2  ;;  %s1022_s12 = scalar_lea.vmem %s1076_s5, %s791_s15 }
  0x19   : > { %s1017_s26 = scalar_lea.vmem %s1073_s2, %s788_s7  ;;  %s1028_s28 = scalar_lea.vmem %s1077_s6, %s791_s15 }
  0x1a   : > { %s391_s29 = scalar_select %p390_p9, %s915_s21, 3 }
  0x1b   : > { %410 = sbr.rel (%p794_p10) target bundleno = 34 (0x22), region = 48 }
  0x1c   : > { %s789_s16 = sshll.u32 %s391_s29, 2 }
  0x1d   : > { %s1033_s19 = scalar_lea.vmem %s1074_s3, %s789_s16 }
  0x22 PF: > { %v883_v1 = vld [vmem:[%s375_s30] sm:$0xff]   ;;  %v934_v2 = vmov 0.0   ;;  %vm428_vm1 = vcmask 64512   ;;  %vm935_vm2 = vmmov 0   ;;  %vm476_vm3 = vcmask 130048   ;;  %v553_v43 = vld [vmem:[#allocation2 + $0x8] sm:$0xff] }
  0x23   : > { %822 = vmatprep.subr.bf16.mxu0 %v934_v2  ;;  %v809_v3 = vld [vmem:[%s364_s13] sm:$0xff]   ;;  %828 = vmatprep.subr.bf16.mxu1 %v934_v2  ;;  %v433_v4 = vsel %vm428_vm1, %v883_v1, 0  ;;  %vm559_vm4 = vcmask 1043456   ;;  %vm606_vm5 = vcmask 261120   ;;  %p800_p11 = scmp.ne.s32.totalorder %s915_s21, 3 }
  0x24   : > { %824 = vmatprep.mubr.msk.bf16.mxu0 %vm935_vm2, %v934_v2  ;;  %v810_v5 = vunpack.c.l.bf16 %v809_v3  ;;  %v811_v6 = vunpack.c.h.bf16 %v809_v3  ;;  %830 = vmatprep.mubr.msk.bf16.mxu1 %vm935_vm2, %v934_v2  ;;  %v884_v26 = vld [vmem:[%s1017_s26] sm:$0xff]   ;;  %vm638_vm6 = vcmask (!%p800_p11), 257024  }
  0x25   : > { %823 = vmatpush3.bf16.xpose.msra.mxu0 %v433_v4  ;;  %829 = vmatpush3.bf16.msra.mxu1 %v884_v26  ;;  %v555_v31 = vld [vmem:[%s1033_s19] sm:$0xf] }
  0x26   : > { %v418_v7 = vmul.f32 0.35355338, %v810_v5  ;;  %v419_v8 = vmul.f32 0.35355338, %v811_v6  ;;  %834 = vmatprep.subr.bf16.mxu1 %v934_v2  ;;  %v561_v35 = vsel %vm559_vm4, %v555_v31, 0  ;;  %v552_v41 = vld [vmem:[#allocation2] sm:$0xff] }
  0x27   : > { %v801_v51 = vld [vmem:[%s1075_s4] ss:$0 sm:$0xff] (!%p800_p11) }
  0x28   : > { %v420_v9 = vpack.c.bf16 %v419_v8, %v418_v7  ;;  %v813_v54 = vld [vmem:[%s1022_s12] sm:$0xff] (!%p800_p11)  }
  0x29   : > { %v814_v55 = vunpack.c.l.bf16 (!%p800_p11), %v813_v54  ;;  %v815_v56 = vunpack.c.h.bf16 (!%p800_p11), %v813_v54 }
  0x2c   : > { %825 = vmatmul.mubr.msk.bf16.vlgmr.msra.gmra.mrb[0].mxu0 %vm428_vm1, %v420_v9 }
  0xff   : > { %v469_v10 = vpop.f32.mrb[0].mxu0 }
 0x100   : > { %v826_v11 = vpop.f32.mrb[1].mxu0  ;;  %v477_v12 = vsel %vm476_vm3, %v469_v10, -inf }
 0x101   : > { %478 = vmax.xlane.f32.xlu0 %v477_v12  ;;  %v472_v13 = vpop.f32.mrb[2].mxu0 }
 0x102   : > { %v827_v14 = vpop.f32.mrb[3].mxu0  ;;  %v480_v15 = vsel %vm476_vm3, %v472_v13, -inf }
 0x105   : > { %481 = vmax.xlane.f32.xlu0 %v480_v15 }
 0x18e   : > { %v479_v16 = vpop.xlane.xlu0 %478 }
 0x18f   : > { %v483_v17 = vsub.f32 %v469_v10, %v479_v16 }
 0x191   : > { %v485_v18 = vmul.f32 1.442695, %v483_v17 }
 0x192   : > { %v482_v19 = vpop.xlane.xlu0 %481 }
 0x193   : > { %885 = vpow2.f32 %v485_v18  ;;  %v484_v20 = vsub.f32 %v472_v13, %v482_v19 }
 0x195   : > { %v487_v21 = vmul.f32 1.442695, %v484_v20 }
 0x197   : > { %887 = vpow2.f32 %v487_v21 }
 0x19d   : > { %v886_v22 = vpop.eup %885 }
 0x19e   : > { %v489_v23 = vsel %vm476_vm3, %v886_v22, 0.0 }
 0x19f   : > { %490 = vadd.xlane.f32.xlu1 %v489_v23 }
 0x1a1   : > { %v888_v24 = vpop.eup %887 }
 0x1a2   : > { %v492_v25 = vsel %vm476_vm3, %v888_v24, 0.0 }
 0x1a3   : > { %493 = vadd.xlane.f32.xlu1 %v492_v25 }
 0x22c   : > { %v491_v27 = vpop.xlane.xlu1 %490 }
 0x22d   : > { %889 = vrcp.f32 %v491_v27 }
 0x230   : > { %v494_v28 = vpop.xlane.xlu1 %493 }
 0x231   : > { %891 = vrcp.f32 %v494_v28 }
 0x237   : > { %v890_v29 = vpop.eup %889 }
 0x238   : > { %v496_v32 = vmul.f32 %v890_v29, %v886_v22 }
 0x23b   : > { %v892_v30 = vpop.eup %891 }
 0x23c   : > { %v498_v33 = vmul.f32 %v892_v30, %v888_v24 }
 0x23e   : > { %v499_v34 = vpack.c.bf16 %v498_v33, %v496_v32 }
 0x240   : > { %831 = vmatmul.mubr.msk.bf16.vlgmr.msra.gmra.mrb[0].mxu1 %vm476_vm3, %v499_v34 }
 0x241   : > { %835 = vmatpush3.bf16.msra.mxu1 %v561_v35  ;;  %836 = vmatprep.mubr.msk.bf16.mxu1 %vm935_vm2, %v934_v2 }
 0x313   : > { %v545_v36 = vpop.f32.mrb[0].mxu1 }
 0x314   : > { %v832_v37 = vpop.f32.mrb[1].mxu1 }
 0x315   : > { %v548_v38 = vpop.f32.mrb[2].mxu1 }
 0x316   : > { %v554_v39 = vpack.c.bf16 %v548_v38, %v545_v36  ;;  %v833_v40 = vpop.f32.mrb[3].mxu1 }
 0x318   : > { %837 = vmatmul.mubr.msk.bf16.vlgmr.msra.gmra.mrb[4].mxu1 %vm428_vm1, %v554_v39 }
 0x3ea   : > { %612 = sbr.rel (%p800_p11) target bundleno = 1023 (0x3ff), region = 52 }
 0x3eb   : > { %v597_v42 = vpop.f32.mrb[4].mxu1 }
 0x3ec   : > { %v604_v44 = vadd.f32 %v597_v42, %v552_v41  ;;  %v838_v45 = vpop.f32.mrb[5].mxu1 }
 0x3ed   : > { %v600_v46 = vpop.f32.mrb[6].mxu1 }
 0x3ee   : > { %607 = vst.msk [vmem:[#allocation2] sm:$0xff] %vm606_vm5, %v604_v44  ;;  %v605_v47 = vadd.f32 %v600_v46, %v553_v43  ;;  %v839_v48 = vpop.f32.mrb[7].mxu1 }
 0x3f0   : > { %608 = vst.msk [vmem:[#allocation2 + $0x8] sm:$0xff] %vm606_vm5, %v605_v47 }
 0x3f5   : > { %v613_v49 = vld [vmem:[#allocation2] sm:$0xff] }
 0x3f6   : > { %v622_v52 = vadd.f32 %v801_v51, %v613_v49 }
 0x3f7   : > { %v614_v50 = vld [vmem:[#allocation2 + $0x8] sm:$0xff] }
 0x3f8   : > { %v623_v53 = vadd.f32 %v801_v51, %v614_v50  ;;  %v628_v57 = vadd.f32 %v814_v55, %v622_v52 }
 0x3fa   : > { %v629_v58 = vadd.f32 %v815_v56, %v623_v53  ;;  %v806_v59 = vpack.c.bf16 %v628_v57, %v628_v57 }
 0x3fc   : > { %v807_v60 = vpack.c.bf16 %v629_v58, %v629_v58  ;;  %639 = vst.msk [vmem:[%s1028_s28] sm:$0xf] %vm638_vm6, %v806_v59 }
 0x3fe   : > { %640 = vst.msk [vmem:[%s1028_s28 + $0x4] sm:$0xf] %vm638_vm6, %v807_v60 }
 0x3ff PF: > { %s16_s25 = sadd.s32 1, %s931_s25   ;;  %s1080_s13 = sld [smem:[#allocation3_spill]] }
 0x400   : > { %p13_p12 = scmp.ge.s32.totalorder %s16_s25, 10   ;;  %s1081_s15 = sld [smem:[#allocation4_spill]] }
 0x401   : > { %s1082_s21 = smov %s923_s23  ;;  %s1083_s22 = smov %s927_s24 }
 0x402   :  { %15 = sbr.rel (!%p13_p12) target bundleno = 3 (0x3), region = 94 }
 0x405   : > { %s1084_s23 = smov %s1080_s13 }
 0x406   : > { %s1085_s24 = smov %s1081_s15 }

// kernel: siglip_vision_model.19
= control target key start
LH: loop header
LB: loop body
LE: loop exit
PB: predicated region body
PF: predicated region fallthrough
CT: control target
= control target key end

     0   :  { %vm23_vm0 = vcmask 261120   ;;  %s224_s0 = inlined_call_operand.vmem [shape: bf16[32,32], index: 0, kind: input, shape index: {}]   ;;  %s225_s1 = inlined_call_operand.vmem [shape: f32[1,32], index: 1, kind: input, shape index: {}]   ;;  %s226_s2 = inlined_call_operand.vmem [shape: f32[1,32], index: 2, kind: input, shape index: {}]   ;;  %s227_s3 = inlined_call_operand.hbm [shape: f32[32,32], index: 3, kind: output, shape index: {}]  }
   0x1   :  { %v122_v0 = vld [vmem:[%s224_s0] sm:$0xff]   ;;  %v129_v1 = vld [vmem:[%s224_s0 + $0x8] sm:$0xff]  }
   0x2   :  { %8 = vsyncpa [#allocation3], 0  ;;  %v123_v2 = vunpack.c.l.bf16 %v122_v0  ;;  %v127_v3 = vunpack.c.l.bf16 %v129_v1  ;;  %v124_v4 = vunpack.c.h.bf16 %v122_v0  ;;  %v128_v5 = vunpack.c.h.bf16 %v129_v1  ;;  %v119_v43 = vld [vmem:[%s225_s1] ss:$0 sm:$0xff]  ;;  %s165_s1 = smov [#allocation2]  }
   0x3   :  { %v120_v45 = vld [vmem:[%s226_s2] ss:$0 sm:$0xff]  ;;  %s108_s19 = sshll.u32 %s165_s1, 4  ;;  %s109_s19 = int_to_ptr.vmem [resolvable:$true] %s108_s19 }
   0x4   :  { %v24_v6 = vsel %vm23_vm0, %v123_v2, 0.0  ;;  %v30_v7 = vsel %vm23_vm0, %v127_v3, 0.0  ;;  %v27_v8 = vsel %vm23_vm0, %v124_v4, 0.0  ;;  %v33_v9 = vsel %vm23_vm0, %v128_v5, 0.0  ;;  %s141_s2 = scalar_lea.vmem %s109_s19, 512  ;;  %p146_p1 = scmp.lt.s32.totalorder %s109_s19, %s109_s19 }
   0x5   :  { %25 = vadd.xlane.f32.xlu0 %v24_v6  ;;  %31 = vadd.xlane.f32.xlu1 %v30_v7  ;;  %p142_p0 = scmp.ne.s32.totalorder %s109_s19, %s141_s2  ;;  %p147_p2 = scmp.lt.s32.totalorder %s141_s2, %s141_s2 }
   0x7   :  { %p148_p3 = por %p147_p2, %p146_p1 }
   0x9   :  { %28 = vadd.xlane.f32.xlu0 %v27_v8  ;;  %34 = vadd.xlane.f32.xlu1 %v33_v9  ;;  %p149_p4 = pnand %p148_p3, %p142_p0 }
  0x92   :  { %v26_v10 = vpop.xlane.xlu0 %25  ;;  %v32_v11 = vpop.xlane.xlu1 %31 }
  0x93   :  { %v37_v12 = vmul.f32 0.03125, %v26_v10  ;;  %v39_v13 = vmul.f32 0.03125, %v32_v11 }
  0x95   :  { %v41_v14 = vsub.f32 %v123_v2, %v37_v12  ;;  %v43_v15 = vsub.f32 %v127_v3, %v39_v13 }
  0x96   :  { %v29_v16 = vpop.xlane.xlu0 %28  ;;  %v35_v17 = vpop.xlane.xlu1 %34 }
  0x97   :  { %v38_v18 = vmul.f32 0.03125, %v29_v16  ;;  %v40_v19 = vmul.f32 0.03125, %v35_v17  ;;  %v45_v20 = vmul.f32 %v41_v14, %v41_v14  ;;  %v47_v21 = vmul.f32 %v43_v15, %v43_v15 }
  0x99   :  { %v42_v22 = vsub.f32 %v124_v4, %v38_v18  ;;  %v44_v23 = vsub.f32 %v128_v5, %v40_v19  ;;  %v49_v24 = vsel %vm23_vm0, %v45_v20, 0.0  ;;  %v55_v25 = vsel %vm23_vm0, %v47_v21, 0.0 }
  0x9a   :  { %50 = vadd.xlane.f32.xlu0 %v49_v24 }
  0x9b   :  { %v46_v26 = vmul.f32 %v42_v22, %v42_v22  ;;  %v48_v27 = vmul.f32 %v44_v23, %v44_v23 }
  0x9d   :  { %v52_v28 = vsel %vm23_vm0, %v46_v26, 0.0  ;;  %v58_v29 = vsel %vm23_vm0, %v48_v27, 0.0 }
  0x9e   :  { %56 = vadd.xlane.f32.xlu0 %v55_v25  ;;  %53 = vadd.xlane.f32.xlu1 %v52_v28 }
  0xa2   :  { %59 = vadd.xlane.f32.xlu1 %v58_v29 }
 0x127   :  { %v51_v30 = vpop.xlane.xlu0 %50 }
 0x128   :  { %v61_v31 = vmul.f32 0.03125, %v51_v30 }
 0x12a   :  { %v65_v32 = vadd.f32 1e-06, %v61_v31 }
 0x12b   :  { %v54_v33 = vpop.xlane.xlu1 %53  ;;  %v57_v34 = vpop.xlane.xlu0 %56 }
 0x12c   :  { %133 = vrsqrt.f32 %v65_v32  ;;  %v62_v35 = vmul.f32 0.03125, %v54_v33  ;;  %v63_v36 = vmul.f32 0.03125, %v57_v34 }
 0x12e   :  { %v66_v37 = vadd.f32 1e-06, %v62_v35  ;;  %v67_v38 = vadd.f32 1e-06, %v63_v36 }
 0x12f   :  { %v60_v39 = vpop.xlane.xlu1 %59 }
 0x130   :  { %135 = vrsqrt.f32 %v66_v37  ;;  %v64_v40 = vmul.f32 0.03125, %v60_v39 }
 0x131   :  { %137 = vrsqrt.f32 %v67_v38 }
 0x132   :  { %v68_v41 = vadd.f32 1e-06, %v64_v40 }
 0x134   :  { %139 = vrsqrt.f32 %v68_v41 }
 0x136   :  { %v134_v42 = vpop.eup %133 }
 0x137   :  { %v73_v44 = vmul.f32 %v134_v42, %v41_v14 }
 0x139   :  { %v84_v46 = vmul.f32 %v119_v43, %v73_v44 }
 0x13a   :  { %v136_v47 = vpop.eup %135 }
 0x13b   :  { %v138_v48 = vpop.eup %137  ;;  %v95_v49 = vadd.f32 %v120_v45, %v84_v46  ;;  %v74_v50 = vmul.f32 %v136_v47, %v42_v22 }
 0x13c   :  { %v75_v51 = vmul.f32 %v138_v48, %v43_v15 }
 0x13d   :  { %99 = vst.msk [vmem:[#allocation2] sm:$0xff] %vm23_vm0, %v95_v49  ;;  %v85_v52 = vmul.f32 %v119_v43, %v74_v50 }
 0x13e   :  { %v140_v53 = vpop.eup %139  ;;  %v86_v54 = vmul.f32 %v119_v43, %v75_v51 }
 0x13f   :  { %v96_v55 = vadd.f32 %v120_v45, %v85_v52  ;;  %v76_v56 = vmul.f32 %v140_v53, %v44_v23 }
 0x140   :  { %v97_v57 = vadd.f32 %v120_v45, %v86_v54 }
 0x141   :  { %100 = vst.msk [vmem:[#allocation2 + $0x8] sm:$0xff] %vm23_vm0, %v96_v55  ;;  %v87_v58 = vmul.f32 %v119_v43, %v76_v56 }
 0x142   :  { %101 = vst.msk [vmem:[#allocation2 + $0x10] sm:$0xff] %vm23_vm0, %v97_v57 }
 0x143   :  { %v98_v59 = vadd.f32 %v120_v45, %v87_v58 }
 0x145   :  { %102 = vst.msk [vmem:[#allocation2 + $0x18] sm:$0xff] %vm23_vm0, %v98_v59 }
 0x146   :  { %152 = shalt.err (!%p149_p4)
}
 0x147   :  { %s153_s22 = scalar_lea.hbm %s227_s3, 512 }
 0x148   :  { %p154_p5 = scmp.ne.s32.totalorder %s227_s3, %s153_s22  ;;  %p157_p6 = scmp.lt.u32.totalorder %s153_s22, %s227_s3 }
 0x14a   :  { %p159_p7 = pnand %p157_p6, %p154_p5 }
 0x14c   :  { %162 = shalt.err (!%p159_p7)
}
 0x14d   :  { %s166_s27 = smov 128   ;;  %s167_s28 = smov 8  }
 0x14e   :  { %114 = dma.vmem_to_hbm [thread:$0]  %s109_s19, 512, %s227_s3, [#allocation3], %s166_s27, %s166_s27, %s167_s28  }
 0x14f   :  { %163 = dma.done.wait [#allocation3], 512  }
 0x150   :  { %164 = vsyncadd [#allocation3], 4294966784 }
 0x151   :  { %118 = vsyncpa [#allocation3], 1 }

// kernel: siglip_vision_model.14
= control target key start
LH: loop header
LB: loop body
LE: loop exit
PB: predicated region body
PF: predicated region fallthrough
CT: control target
= control target key end

     0   :  { %vm71_vm0 = vcmask 523264   ;;  %vm155_vm1 = vcmask 257024   ;;  %s278_s1 = inlined_call_operand.vmem [shape: bf16[64,32], index: 1, kind: input, shape index: {}]   ;;  %s279_s0 = inlined_call_operand.vmem [shape: bf16[32,64], index: 0, kind: input, shape index: {}]   ;;  %s280_s3 = inlined_call_operand.vmem [shape: bf16[32,32], index: 3, kind: input, shape index: {}]   ;;  %s281_s2 = inlined_call_operand.vmem [shape: f32[1,32], index: 2, kind: input, shape index: {}]   ;;  %s282_s4 = inlined_call_operand.vmem [shape: bf16[32,32], index: 4, kind: output, shape index: {}]  }
   0x1   :  { %v208_v0 = vld [vmem:[%s278_s1] sm:$0xff]   ;;  %v209_v1 = vld [vmem:[%s278_s1 + $0x8] sm:$0xff]   ;;  %v210_v2 = vld [vmem:[%s278_s1 + $0x10] sm:$0xff]  }
   0x2   :  { %196 = vmatprep.subr.bf16.mxu0 %v208_v0  ;;  %v212_v3 = vld [vmem:[%s279_s0] sm:$0xff]   ;;  %v211_v4 = vld [vmem:[%s278_s1 + $0x18] sm:$0xff]   ;;  %v213_v5 = vld [vmem:[%s279_s0 + $0x8] sm:$0xff]  }
   0x3   :  { %197 = vmatpush3.bf16.msra.mxu0 %v208_v0  ;;  %204 = vmatprep.mubr.msk.bf16.mxu0 %vm71_vm0, %v212_v3  ;;  %v189_v6 = vld [vmem:[%s280_s3 + $0x8] sm:$0xff]   ;;  %v182_v7 = vld [vmem:[%s280_s3] sm:$0xff]  }
   0x4   :  { %198 = vmatprep.subr.bf16.mxu0 %v209_v1  ;;  %v164_v8 = vld [vmem:[%s281_s2] ss:$0 sm:$0xff]  ;;  %v187_v9 = vunpack.c.l.bf16 %v189_v6  ;;  %v183_v11 = vunpack.c.l.bf16 %v182_v7  ;;  %v188_v14 = vunpack.c.h.bf16 %v189_v6  ;;  %v184_v17 = vunpack.c.h.bf16 %v182_v7 }
   0x7   :  { %199 = vmatpush3.bf16.msra.mxu0 %v209_v1 }
   0x8   :  { %200 = vmatprep.subr.bf16.mxu0 %v210_v2 }
   0xb   :  { %201 = vmatpush3.bf16.msra.mxu0 %v210_v2 }
   0xc   :  { %202 = vmatprep.subr.bf16.mxu0 %v211_v4 }
   0xf   :  { %203 = vmatpush3.bf16.msra.mxu0 %v211_v4 }
  0x12   :  { %205 = vmatmul.mubr.msk.bf16.vlgmr.msra.gmra.mrb[0].mxu0 %vm71_vm0, %v213_v5 }
  0xe5   :  { %v206_v10 = vpop.f32.mrb[0].mxu0 }
  0xe6   :  { %v121_v12 = vadd.f32 %v206_v10, %v164_v8  ;;  %v112_v13 = vpop.f32.mrb[1].mxu0 }
  0xe7   :  { %v113_v15 = vadd.f32 %v164_v8, %v112_v13  ;;  %v207_v16 = vpop.f32.mrb[2].mxu0 }
  0xe8   :  { %v137_v18 = vadd.f32 %v187_v9, %v121_v12  ;;  %v124_v19 = vadd.f32 %v207_v16, %v164_v8  ;;  %v115_v20 = vpop.f32.mrb[3].mxu0 }
  0xe9   :  { %v135_v21 = vadd.f32 %v183_v11, %v113_v15  ;;  %v116_v22 = vadd.f32 %v164_v8, %v115_v20 }
  0xea   :  { %v179_v23 = vpack.c.bf16 %v137_v18, %v137_v18  ;;  %v138_v24 = vadd.f32 %v188_v14, %v124_v19 }
  0xeb   :  { %v177_v25 = vpack.c.bf16 %v135_v21, %v135_v21  ;;  %v136_v26 = vadd.f32 %v184_v17, %v116_v22 }
  0xec   :  { %158 = vst.msk [vmem:[%s282_s4 + $0x8] sm:$0xf] %vm155_vm1, %v179_v23  ;;  %v180_v27 = vpack.c.bf16 %v138_v24, %v138_v24 }
  0xed   :  { %156 = vst.msk [vmem:[%s282_s4] sm:$0xf] %vm155_vm1, %v177_v25  ;;  %v178_v28 = vpack.c.bf16 %v136_v26, %v136_v26 }
  0xee   :  { %159 = vst.msk [vmem:[%s282_s4 + $0xc] sm:$0xf] %vm155_vm1, %v180_v27 }
  0xef   :  { %157 = vst.msk [vmem:[%s282_s4 + $0x4] sm:$0xf] %vm155_vm1, %v178_v28 }

// kernel: siglip_vision_model.13
= control target key start
LH: loop header
LB: loop body
LE: loop exit
PB: predicated region body
PF: predicated region fallthrough
CT: control target
= control target key end

     0   :  { %vm33_vm0 = vcmask 261120   ;;  %vm246_vm1 = vcmask 519168   ;;  %s384_s0 = inlined_call_operand.vmem [shape: bf16[32,32], index: 0, kind: input, shape index: {}]   ;;  %s385_s3 = inlined_call_operand.vmem [shape: bf16[32,64], index: 3, kind: input, shape index: {}]   ;;  %s386_s1 = inlined_call_operand.vmem [shape: f32[1,32], index: 1, kind: input, shape index: {}]   ;;  %s387_s2 = inlined_call_operand.vmem [shape: f32[1,32], index: 2, kind: input, shape index: {}]   ;;  %s388_s4 = inlined_call_operand.vmem [shape: f32[1,64], index: 4, kind: input, shape index: {}]   ;;  %s389_s5 = inlined_call_operand.vmem [shape: bf16[32,64], index: 5, kind: output, shape index: {}]  }
   0x1   :  { %v271_v0 = vld [vmem:[%s384_s0] sm:$0xff]   ;;  %v278_v1 = vld [vmem:[%s384_s0 + $0x8] sm:$0xff]  }
   0x2   :  { %v272_v2 = vunpack.c.l.bf16 %v271_v0  ;;  %v276_v3 = vunpack.c.l.bf16 %v278_v1  ;;  %v273_v4 = vunpack.c.h.bf16 %v271_v0  ;;  %v277_v5 = vunpack.c.h.bf16 %v278_v1  ;;  %v291_v30 = vld [vmem:[%s385_s3] sm:$0xff]   ;;  %v292_v31 = vld [vmem:[%s385_s3 + $0x8] sm:$0xff]  }
   0x3   :  { %283 = vmatprep.subr.bf16.mxu0 %v291_v30  ;;  %v255_v46 = vld [vmem:[%s386_s1] ss:$0 sm:$0xff] }
   0x4   :  { %v34_v6 = vsel %vm33_vm0, %v272_v2, 0.0  ;;  %v40_v7 = vsel %vm33_vm0, %v276_v3, 0.0  ;;  %v37_v8 = vsel %vm33_vm0, %v273_v4, 0.0  ;;  %v43_v9 = vsel %vm33_vm0, %v277_v5, 0.0  ;;  %284 = vmatpush3.bf16.msra.mxu0 %v291_v30  ;;  %v256_v51 = vld [vmem:[%s387_s2] ss:$0 sm:$0xff] }
   0x5   :  { %35 = vadd.xlane.f32.xlu0 %v34_v6  ;;  %41 = vadd.xlane.f32.xlu1 %v40_v7 }
   0x6   :  { %285 = vmatprep.subr.bf16.mxu0 %v292_v31 }
   0x8   :  { %286 = vmatpush3.bf16.msra.mxu0 %v292_v31 }
   0x9   :  { %38 = vadd.xlane.f32.xlu0 %v37_v8  ;;  %44 = vadd.xlane.f32.xlu1 %v43_v9 }
  0x92   :  { %v36_v10 = vpop.xlane.xlu0 %35  ;;  %v42_v11 = vpop.xlane.xlu1 %41 }
  0x93   :  { %v47_v12 = vmul.f32 0.03125, %v36_v10  ;;  %v49_v13 = vmul.f32 0.03125, %v42_v11 }
  0x95   :  { %v51_v14 = vsub.f32 %v272_v2, %v47_v12  ;;  %v53_v15 = vsub.f32 %v276_v3, %v49_v13  ;;  %v257_v2 = vld [vmem:[%s388_s4] ss:$0 sm:$0xff] }
  0x96   :  { %v39_v16 = vpop.xlane.xlu0 %38  ;;  %v45_v17 = vpop.xlane.xlu1 %44 }
  0x97   :  { %v48_v18 = vmul.f32 0.03125, %v39_v16  ;;  %v50_v19 = vmul.f32 0.03125, %v45_v17  ;;  %v55_v20 = vmul.f32 %v51_v14, %v51_v14  ;;  %v57_v21 = vmul.f32 %v53_v15, %v53_v15 }
  0x99   :  { %v52_v22 = vsub.f32 %v273_v4, %v48_v18  ;;  %v54_v23 = vsub.f32 %v277_v5, %v50_v19  ;;  %v59_v24 = vsel %vm33_vm0, %v55_v20, 0.0  ;;  %v65_v25 = vsel %vm33_vm0, %v57_v21, 0.0 }
  0x9a   :  { %60 = vadd.xlane.f32.xlu0 %v59_v24 }
  0x9b   :  { %v56_v26 = vmul.f32 %v52_v22, %v52_v22  ;;  %v58_v27 = vmul.f32 %v54_v23, %v54_v23 }
  0x9d   :  { %v62_v28 = vsel %vm33_vm0, %v56_v26, 0.0  ;;  %v68_v29 = vsel %vm33_vm0, %v58_v27, 0.0 }
  0x9e   :  { %66 = vadd.xlane.f32.xlu0 %v65_v25  ;;  %63 = vadd.xlane.f32.xlu1 %v62_v28 }
  0xa2   :  { %69 = vadd.xlane.f32.xlu1 %v68_v29 }
 0x127   :  { %v61_v32 = vpop.xlane.xlu0 %60 }
 0x128   :  { %v71_v33 = vmul.f32 0.03125, %v61_v32 }
 0x12a   :  { %v75_v34 = vadd.f32 1e-06, %v71_v33 }
 0x12b   :  { %v64_v35 = vpop.xlane.xlu1 %63  ;;  %v67_v36 = vpop.xlane.xlu0 %66 }
 0x12c   :  { %293 = vrsqrt.f32 %v75_v34  ;;  %v72_v37 = vmul.f32 0.03125, %v64_v35  ;;  %v73_v38 = vmul.f32 0.03125, %v67_v36 }
 0x12e   :  { %v76_v39 = vadd.f32 1e-06, %v72_v37  ;;  %v77_v40 = vadd.f32 1e-06, %v73_v38 }
 0x12f   :  { %v70_v41 = vpop.xlane.xlu1 %69 }
 0x130   :  { %295 = vrsqrt.f32 %v76_v39  ;;  %v74_v42 = vmul.f32 0.03125, %v70_v41 }
 0x131   :  { %297 = vrsqrt.f32 %v77_v40 }
 0x132   :  { %v78_v43 = vadd.f32 1e-06, %v74_v42 }
 0x134   :  { %299 = vrsqrt.f32 %v78_v43 }
 0x136   :  { %v294_v44 = vpop.eup %293 }
 0x137   :  { %v83_v45 = vmul.f32 %v294_v44, %v51_v14 }
 0x139   :  { %v94_v49 = vmul.f32 %v255_v46, %v83_v45 }
 0x13a   :  { %v296_v47 = vpop.eup %295 }
 0x13b   :  { %v298_v48 = vpop.eup %297  ;;  %v84_v50 = vmul.f32 %v296_v47, %v52_v22  ;;  %v105_v55 = vadd.f32 %v256_v51, %v94_v49 }
 0x13c   :  { %v85_v52 = vmul.f32 %v298_v48, %v53_v15 }
 0x13d   :  { %v95_v53 = vmul.f32 %v255_v46, %v84_v50 }
 0x13e   :  { %v300_v54 = vpop.eup %299  ;;  %v96_v57 = vmul.f32 %v255_v46, %v85_v52 }
 0x13f   :  { %v106_v56 = vadd.f32 %v256_v51, %v95_v53  ;;  %v86_v58 = vmul.f32 %v300_v54, %v54_v23 }
 0x140   :  { %v107_v61 = vadd.f32 %v256_v51, %v96_v57 }
 0x141   :  { %v109_v59 = vpack.c.bf16 %v106_v56, %v105_v55  ;;  %v97_v60 = vmul.f32 %v255_v46, %v86_v58 }
 0x143   :  { %111 = vst.msk [vmem:[#allocation2] sm:$0xff] %vm33_vm0, %v109_v59  ;;  %v108_v62 = vadd.f32 %v256_v51, %v97_v60 }
 0x145   :  { %v110_v63 = vpack.c.bf16 %v108_v62, %v107_v61 }
 0x147   :  { %112 = vst.msk [vmem:[#allocation2 + $0x8] sm:$0xff] %vm33_vm0, %v110_v63 }
 0x14a   :  { %v113_v0 = vld [vmem:[#allocation2] sm:$0xff] }
 0x14b   :  { %287 = vmatprep.mubr.msk.bf16.mxu0 %vm33_vm0, %v113_v0 }
 0x14e   :  { %v114_v1 = vld [vmem:[#allocation2 + $0x8] sm:$0xff] }
 0x14f   :  { %288 = vmatmul.mubr.msk.bf16.vlgmr.msra.gmra.mrb[0].mxu0 %vm33_vm0, %v114_v1 }
 0x222   :  { %v289_v3 = vpop.f32.mrb[0].mxu0 }
 0x223   :  { %v188_v4 = vadd.f32 %v289_v3, %v257_v2  ;;  %v179_v5 = vpop.f32.mrb[1].mxu0 }
 0x224   :  { %v180_v6 = vadd.f32 %v257_v2, %v179_v5  ;;  %v290_v7 = vpop.f32.mrb[2].mxu0 }
 0x225   :  { %v200_v8 = vmul.f32 %v188_v4, %v188_v4  ;;  %v191_v9 = vadd.f32 %v290_v7, %v257_v2  ;;  %v182_v10 = vpop.f32.mrb[3].mxu0  ;;  %v196_v33 = vmul.f32 0.5, %v188_v4 }
 0x226   :  { %v198_v11 = vmul.f32 %v180_v6, %v180_v6  ;;  %v183_v12 = vadd.f32 %v257_v2, %v182_v10  ;;  %v194_v36 = vmul.f32 0.5, %v180_v6 }
 0x227   :  { %v204_v13 = vmul.f32 %v200_v8, %v188_v4  ;;  %v201_v14 = vmul.f32 %v191_v9, %v191_v9  ;;  %v197_v40 = vmul.f32 0.5, %v191_v9 }
 0x228   :  { %v202_v15 = vmul.f32 %v198_v11, %v180_v6  ;;  %v199_v16 = vmul.f32 %v183_v12, %v183_v12  ;;  %v195_v43 = vmul.f32 0.5, %v183_v12 }
 0x229   :  { %v208_v17 = vmul.f32 0.044715, %v204_v13  ;;  %v205_v18 = vmul.f32 %v201_v14, %v191_v9 }
 0x22a   :  { %v206_v19 = vmul.f32 0.044715, %v202_v15  ;;  %v203_v20 = vmul.f32 %v199_v16, %v183_v12 }
 0x22b   :  { %v212_v21 = vadd.f32 %v208_v17, %v188_v4  ;;  %v209_v22 = vmul.f32 0.044715, %v205_v18 }
 0x22c   :  { %v210_v23 = vadd.f32 %v206_v19, %v180_v6  ;;  %v207_v24 = vmul.f32 0.044715, %v203_v20 }
 0x22d   :  { %v216_v25 = vmul.f32 0.7978846, %v212_v21  ;;  %v213_v26 = vadd.f32 %v209_v22, %v191_v9 }
 0x22e   :  { %v214_v27 = vmul.f32 0.7978846, %v210_v23  ;;  %v211_v28 = vadd.f32 %v207_v24, %v183_v12 }
 0x22f   :  { %301 = vtanh.f32 %v216_v25  ;;  %v217_v29 = vmul.f32 0.7978846, %v213_v26 }
 0x230   :  { %303 = vtanh.f32 %v214_v27  ;;  %v215_v30 = vmul.f32 0.7978846, %v211_v28 }
 0x231   :  { %305 = vtanh.f32 %v217_v29 }
 0x232   :  { %307 = vtanh.f32 %v215_v30 }
 0x239   :  { %v302_v31 = vpop.eup %301 }
 0x23a   :  { %v304_v32 = vpop.eup %303  ;;  %v224_v34 = vadd.f32 1.0, %v302_v31 }
 0x23b   :  { %v306_v35 = vpop.eup %305  ;;  %v222_v37 = vadd.f32 1.0, %v304_v32 }
 0x23c   :  { %v308_v38 = vpop.eup %307  ;;  %v228_v39 = vmul.f32 %v224_v34, %v196_v33  ;;  %v225_v41 = vadd.f32 1.0, %v306_v35 }
 0x23d   :  { %v226_v42 = vmul.f32 %v222_v37, %v194_v36  ;;  %v223_v44 = vadd.f32 1.0, %v308_v38 }
 0x23e   :  { %v268_v45 = vpack.c.bf16 %v228_v39, %v228_v39  ;;  %v229_v46 = vmul.f32 %v225_v41, %v197_v40 }
 0x23f   :  { %v266_v47 = vpack.c.bf16 %v226_v42, %v226_v42  ;;  %v227_v48 = vmul.f32 %v223_v44, %v195_v43 }
 0x240   :  { %249 = vst.msk [vmem:[%s389_s5 + $0x8] sm:$0xf] %vm246_vm1, %v268_v45  ;;  %v269_v49 = vpack.c.bf16 %v229_v46, %v229_v46 }
 0x241   :  { %247 = vst.msk [vmem:[%s389_s5] sm:$0xf] %vm246_vm1, %v266_v47  ;;  %v267_v50 = vpack.c.bf16 %v227_v48, %v227_v48 }
 0x242   :  { %250 = vst.msk [vmem:[%s389_s5 + $0xc] sm:$0xf] %vm246_vm1, %v269_v49 }
 0x243   :  { %248 = vst.msk [vmem:[%s389_s5 + $0x4] sm:$0xf] %vm246_vm1, %v267_v50 }

</bundles_post_ra>
